<compile_context>
chip_gen: v5e
topology: v5e:2x2
jax: 0.10.0
libtpu: 0.0.40
codegen_flags: <defaults>
</compile_context>

<pallas_src>
import functools

import jax
import jax.numpy as jnp
from jax import lax
from jax.experimental import pallas as pl
from jax.experimental.pallas import tpu as pltpu

# weights_each_embedding_layer from C2R.__init__
LAYER_WEIGHTS = (1 / 32.0, 1 / 16.0, 1 / 2.0, 1.0)
_COS_EPS = 1e-6       # nn.CosineSimilarity eps
_LOG_EPS = 1e-7       # eps inside the log denominator
_TEMP = 0.5           # sim_cl temperature

# Spatial (lane) tile.  512 lanes * (120 total channels + 8 mask rows) * 2
# buffers stays far inside the scoped-VMEM budget of v5e/v6e/v7x; no
# vmem_limit_bytes override needed.
_HW_BLOCK = 512

# Rows of the stacked [B, 8, HW] mask tensor (rows 6, 7 are zero padding for
# sublane alignment of the MXU operand).
_TP, _FP, _FN_PS, _FN_HS1, _FN_HS2, _FN_HS3 = 0, 1, 2, 3, 4, 5
_NUM_MASKS = 8


def _c2r_fused_kernel(num_layers, masks_ref, lsum_ref, clw_ref, *rest):
    """Fused C2R kernel.

    masks_ref : [B, 8, hw_tile]   bf16   stacked (tp, fp, fn_ps, fn_hs1/2/3, 0, 0)
    lsum_ref  : [B, 8]            f32    spatial sums of each mask (precomputed)
    clw_ref   : [1, 4]            f32    (hs1_w, hs2_w, hs3_w, ps_w)
    e*_ref    : [B, C_l, hw_tile]        per-layer embedding tiles
    out_ref   : [B, L]            f32    per-sample, per-layer contrastive term
    acc*      : [B, 8, C_l]       f32    VMEM scratch accumulators (masked sums)
    """
    e_refs = rest[:num_layers]
    out_ref = rest[num_layers]
    acc_refs = rest[num_layers + 1:]

    h = pl.program_id(0)

    @pl.when(h == 0)
    def _init():
        for acc in acc_refs:
            acc[...] = jnp.zeros_like(acc)

    # One MXU contraction per layer folds the masked multiply AND the spatial
    # reduction:  acc[b, m, c] += sum_s masks[b, m, s] * emb[b, c, s]
    m_tile = masks_ref[...].astype(e_refs[0].dtype)          # [B, 8, hw_tile]
    for acc, e_ref in zip(acc_refs, e_refs):
        acc[...] += jnp.einsum('bms,bcs->bmc', m_tile, e_ref[...],
                               preferred_element_type=jnp.float32)

    @pl.when(h == pl.num_programs(0) - 1)
    def _finalize():
        ls = lsum_ref[...]                                   # [B, 8]
        clw = clw_ref[...]                                   # [1, 4]
        hs1_w = clw[:, 0:1]
        hs2_w = clw[:, 1:2]
        hs3_w = clw[:, 2:3]
        ps_w = clw[:, 3:4]
        inv_ls = 1.0 / (ls[:, :, None] + 1.0)                # [B, 8, 1]

        for l, acc in enumerate(acc_refs):
            # reduce_mean: (sum(mask*emb) + 1) / (sum(mask) + 1)
            e = (acc[...] + 1.0) * inv_ls                    # [B, 8, C_l]
            # cosine(e_fp, e_m) for every mask row m, clamped like the ref:
            #   dot / max(|fp|*|m|, eps)  ==  dot * rsqrt(max(|fp|^2*|m|^2, eps^2))
            dots = jnp.sum(e * e[:, _FP:_FP + 1, :], axis=2)   # [B, 8]
            nsq = jnp.sum(e * e, axis=2)                       # [B, 8]
            prod = jnp.maximum(nsq[:, _FP:_FP + 1] * nsq, _COS_EPS * _COS_EPS)
            sim = dots * lax.rsqrt(prod) * (1.0 / _TEMP)       # cosine / 0.5 (EUP rsqrt)

            den = (sim[:, _FN_PS:_FN_PS + 1] * ps_w
                   + sim[:, _FN_HS1:_FN_HS1 + 1] * hs1_w
                   + sim[:, _FN_HS2:_FN_HS2 + 1] * hs2_w
                   + sim[:, _FN_HS3:_FN_HS3 + 1] * hs3_w
                   + _LOG_EPS)                                 # [B, 1]
            # Epilogue runs once on [B,1] values; exact divide keeps the log
            # argument bit-close to the f32 reference.
            out_ref[:, l:l + 1] = -jnp.log(sim[:, _TP:_TP + 1] / den)


def _c2r_fused_call(masks, lsum, clw, embs, hw_tile):
    num_layers = len(embs)
    B, M, HW = masks.shape
    grid = (HW // hw_tile,)

    in_specs = (
        [pl.BlockSpec((B, M, hw_tile), lambda h: (0, 0, h)),      # masks (tiled)
         pl.BlockSpec((B, M), lambda h: (0, 0)),                  # lsum (resident)
         pl.BlockSpec((1, clw.shape[1]), lambda h: (0, 0))]       # cl_weights
        + [pl.BlockSpec((B, e.shape[1], hw_tile), lambda h: (0, 0, h))
           for e in embs])                                        # per-layer tiles
    out_spec = pl.BlockSpec((B, num_layers), lambda h: (0, 0))
    scratch = [pltpu.VMEM((B, M, e.shape[1]), jnp.float32) for e in embs]

    kernel = functools.partial(_c2r_fused_kernel, num_layers)
    return pl.pallas_call(
        kernel,
        out_shape=jax.ShapeDtypeStruct((B, num_layers), jnp.float32),
        grid_spec=pltpu.PrefetchScalarGridSpec(
            num_scalar_prefetch=0,
            grid=grid,
            in_specs=in_specs,
            out_specs=out_spec,
            scratch_shapes=scratch),
        compiler_params=pltpu.CompilerParams(
            dimension_semantics=("arbitrary",)),   # HW is a reduction axis
    )(masks, lsum, clw, *embs)


@jax.jit
def c2r_forward(embeddings, y_pred, y_true, ps, hs1, hs2, hs3, cl_weights):
    """embeddings: list of [B, C_i, H, W]; masks: [B, 1, H, W]; cl_weights: [4]."""
    B = y_true.shape[0]
    yt = y_true.reshape(B, -1).astype(jnp.float32)
    yp = y_pred.reshape(B, -1).astype(jnp.float32)
    psf = ps.reshape(B, -1).astype(jnp.float32)
    h1 = hs1.reshape(B, -1).astype(jnp.float32)
    h2 = hs2.reshape(B, -1).astype(jnp.float32)
    h3 = hs3.reshape(B, -1).astype(jnp.float32)
    HW = yt.shape[1]

    # Masks built ONCE (layer-independent); algebra simplified:
    #   fp = pos - pos*ybin = pos*(1-ybin) ;  fn_x = neg - neg*(1-x) = neg*x
    pos = yt
    neg = 1.0 - yt
    ybin = (yp > 0.5).astype(jnp.float32)
    masks6 = jnp.stack([pos * ybin,            # tp
                        pos * (1.0 - ybin),    # fp
                        neg * psf,             # fn_ps
                        neg * h1,              # fn_hs1
                        neg * h2,              # fn_hs2
                        neg * h3],             # fn_hs3
                       axis=1)                                  # [B, 6, HW]
    lsum = jnp.sum(masks6, axis=2)                              # [B, 6] (per-mask area)

    pad_m = _NUM_MASKS - masks6.shape[1]
    # 0/1-valued masks are exact in bf16 -> half the mask HBM traffic.
    masks = jnp.pad(masks6, ((0, 0), (0, pad_m), (0, 0))).astype(jnp.bfloat16)
    lsum = jnp.pad(lsum, ((0, 0), (0, pad_m))).astype(jnp.float32)
    clw = cl_weights.reshape(1, -1).astype(jnp.float32)         # [1, 4]

    # Embeddings keep their input dtype (f32 or bf16); accumulation is f32.
    embs = [e.reshape(e.shape[0], e.shape[1], -1) for e in embeddings]

    hw_tile = _HW_BLOCK if HW % _HW_BLOCK == 0 else HW
    contr = _c2r_fused_call(masks, lsum, clw, embs, hw_tile)    # [B, L]

    w = jnp.asarray(LAYER_WEIGHTS[:len(embs)], jnp.float32)
    return jnp.sum(w * jnp.mean(contr, axis=0))


# ----------------------- pure-JAX reference (PyTorch semantics) ----------------
def _ref_reduce_mean(embed, label):
    e = label * embed                         # [B,C,H,W] * [B,1,H,W]
    e = jnp.sum(e, axis=(2, 3))               # [B, C]
    ls = jnp.sum(label, axis=(2, 3))          # [B, 1]
    return (e + 1.0) / (ls + 1.0)


def _ref_sim_cl(x, y):
    dot = jnp.sum(x * y, axis=1)
    nx = jnp.sqrt(jnp.sum(x * x, axis=1))
    ny = jnp.sqrt(jnp.sum(y * y, axis=1))
    return (dot / jnp.maximum(nx * ny, _COS_EPS)) / _TEMP


def c2r_reference(embeddings, y_pred, y_true, ps, hs1, hs2, hs3, cl_weights):
    hs1_w, hs2_w, hs3_w, ps_w = cl_weights
    pos = y_true
    neg = 1.0 - y_true
    y_bin = (y_pred > 0.5).astype(jnp.float32)
    tp = pos * y_bin
    fp = pos - tp
    fn_ps = neg - neg * (1.0 - ps)
    fn_hs1 = neg - neg * (1.0 - hs1)
    fn_hs2 = neg - neg * (1.0 - hs2)
    fn_hs3 = neg - neg * (1.0 - hs3)
    loss = 0.0
    for w, emb in zip(LAYER_WEIGHTS, embeddings):
        pd = _ref_sim_cl(_ref_reduce_mean(emb, fp), _ref_reduce_mean(emb, tp))
        nps = _ref_sim_cl(_ref_reduce_mean(emb, fp), _ref_reduce_mean(emb, fn_ps))
        n1 = _ref_sim_cl(_ref_reduce_mean(emb, fp), _ref_reduce_mean(emb, fn_hs1))
        n2 = _ref_sim_cl(_ref_reduce_mean(emb, fp), _ref_reduce_mean(emb, fn_hs2))
        n3 = _ref_sim_cl(_ref_reduce_mean(emb, fp), _ref_reduce_mean(emb, fn_hs3))
        contr = -jnp.log(pd / (nps * ps_w + n1 * hs1_w + n2 * hs2_w
                               + n3 * hs3_w + _LOG_EPS))
        loss = loss + w * jnp.mean(contr)
    return loss


if __name__ == "__main__":
    key = jax.random.PRNGKey(0)
    B, H, W = 2, 32, 32                       # HW = 1024 -> grid of 2 spatial tiles
    channels = [8, 16, 32, 64]

    keys = jax.random.split(key, 12)
    # positive embeddings keep all cosine similarities > 0 (no NaNs in the log)
    embeddings = [
        jax.random.uniform(keys[i], (B, c, H, W), jnp.float32, 0.1, 1.0)
        for i, c in enumerate(channels)
    ]
    y_true = (jax.random.uniform(keys[4], (B, 1, H, W)) > 0.5).astype(jnp.float32)
    y_pred = jax.random.uniform(keys[5], (B, 1, H, W), jnp.float32)
    ps = (jax.random.uniform(keys[6], (B, 1, H, W)) > 0.5).astype(jnp.float32)
    hs1 = (jax.random.uniform(keys[7], (B, 1, H, W)) > 0.5).astype(jnp.float32)
    hs2 = (jax.random.uniform(keys[8], (B, 1, H, W)) > 0.5).astype(jnp.float32)
    hs3 = (jax.random.uniform(keys[9], (B, 1, H, W)) > 0.5).astype(jnp.float32)
    cl_weights = jnp.array([0.4, 0.3, 0.2, 0.1], jnp.float32)  # hs1, hs2, hs3, ps

    loss = c2r_forward(embeddings, y_pred, y_true, ps, hs1, hs2, hs3, cl_weights)
    loss = jax.block_until_ready(loss)

    ref = c2r_reference(embeddings, y_pred, y_true, ps, hs1, hs2, hs3, cl_weights)
    assert jnp.isfinite(loss), "loss is not finite"
    assert jnp.allclose(loss, ref, rtol=2e-3, atol=2e-3), (loss, ref)
    print("KERNEL_OK")
</pallas_src>

<mosaic_0001>
module attributes {stable_mosaic.version = 11 : i64} {
  func.func @_c2r_fused_kernel(%arg0: i32, %arg1: memref<2x8x512xbf16, #tpu.memory_space<vmem>>, %arg2: memref<2x8xf32, #tpu.memory_space<vmem>>, %arg3: memref<1x4xf32, #tpu.memory_space<vmem>>, %arg4: memref<2x8x512xf32, #tpu.memory_space<vmem>>, %arg5: memref<2x16x512xf32, #tpu.memory_space<vmem>>, %arg6: memref<2x32x512xf32, #tpu.memory_space<vmem>>, %arg7: memref<2x64x512xf32, #tpu.memory_space<vmem>>, %arg8: memref<2x4xf32, #tpu.memory_space<vmem>>, %arg9: memref<2x8x8xf32, #tpu.memory_space<vmem>>, %arg10: memref<2x8x16xf32, #tpu.memory_space<vmem>>, %arg11: memref<2x8x32xf32, #tpu.memory_space<vmem>>, %arg12: memref<2x8x64xf32, #tpu.memory_space<vmem>>) attributes {dimension_semantics = [#tpu.dimension_semantics<arbitrary>], iteration_bounds = array<i64: 2>, scalar_prefetch = 0 : i64, scratch_operands = 4 : i64, tpu.core_type = #tpu.core_type<tc>, window_params = [{transform_indices = @transform_0, window_bounds = array<i64: 2, 8, 512>}, {pipeline_mode = #tpu.pipeline_mode<synchronous>, transform_indices = @transform_1, window_bounds = array<i64: 2, 8>}, {pipeline_mode = #tpu.pipeline_mode<synchronous>, transform_indices = @transform_2, window_bounds = array<i64: 1, 4>}, {transform_indices = @transform_3, window_bounds = array<i64: 2, 8, 512>}, {transform_indices = @transform_4, window_bounds = array<i64: 2, 16, 512>}, {transform_indices = @transform_5, window_bounds = array<i64: 2, 32, 512>}, {transform_indices = @transform_6, window_bounds = array<i64: 2, 64, 512>}, {pipeline_mode = #tpu.pipeline_mode<synchronous>, transform_indices = @transform_7, window_bounds = array<i64: 2, 4>}]} {
    %c0_i32 = arith.constant 0 : i32
    %0 = arith.cmpi eq, %arg0, %c0_i32 : i32
    %1 = arith.extui %0 : i1 to i32
    %c0_i32_0 = arith.constant 0 : i32
    %2 = arith.cmpi ne, %1, %c0_i32_0 : i32
    scf.if %2 {
      %cst_43 = arith.constant 0.000000e+00 : f32
      %28 = vector.broadcast %cst_43 : f32 to vector<2x8x8xf32>
      %c0_44 = arith.constant 0 : index
      %c0_45 = arith.constant 0 : index
      %c0_46 = arith.constant 0 : index
      %29 = vector.load %arg9[%c0_44, %c0_45, %c0_46] : memref<2x8x8xf32, #tpu.memory_space<vmem>>, vector<2x8x8xf32>
      tpu.vector_store %arg9[%c0_44, %c0_45, %c0_46], %28 {strides = array<i32>} : memref<2x8x8xf32, #tpu.memory_space<vmem>>, vector<2x8x8xf32>,
      %cst_47 = arith.constant 0.000000e+00 : f32
      %30 = vector.broadcast %cst_47 : f32 to vector<2x8x16xf32>
      %c0_48 = arith.constant 0 : index
      %c0_49 = arith.constant 0 : index
      %c0_50 = arith.constant 0 : index
      %31 = vector.load %arg10[%c0_48, %c0_49, %c0_50] : memref<2x8x16xf32, #tpu.memory_space<vmem>>, vector<2x8x16xf32>
      tpu.vector_store %arg10[%c0_48, %c0_49, %c0_50], %30 {strides = array<i32>} : memref<2x8x16xf32, #tpu.memory_space<vmem>>, vector<2x8x16xf32>,
      %cst_51 = arith.constant 0.000000e+00 : f32
      %32 = vector.broadcast %cst_51 : f32 to vector<2x8x32xf32>
      %c0_52 = arith.constant 0 : index
      %c0_53 = arith.constant 0 : index
      %c0_54 = arith.constant 0 : index
      %33 = vector.load %arg11[%c0_52, %c0_53, %c0_54] : memref<2x8x32xf32, #tpu.memory_space<vmem>>, vector<2x8x32xf32>
      tpu.vector_store %arg11[%c0_52, %c0_53, %c0_54], %32 {strides = array<i32>} : memref<2x8x32xf32, #tpu.memory_space<vmem>>, vector<2x8x32xf32>,
      %cst_55 = arith.constant 0.000000e+00 : f32
      %34 = vector.broadcast %cst_55 : f32 to vector<2x8x64xf32>
      %c0_56 = arith.constant 0 : index
      %c0_57 = arith.constant 0 : index
      %c0_58 = arith.constant 0 : index
      %35 = vector.load %arg12[%c0_56, %c0_57, %c0_58] : memref<2x8x64xf32, #tpu.memory_space<vmem>>, vector<2x8x64xf32>
      tpu.vector_store %arg12[%c0_56, %c0_57, %c0_58], %34 {strides = array<i32>} : memref<2x8x64xf32, #tpu.memory_space<vmem>>, vector<2x8x64xf32>,
    } else {
    }
    %c0 = arith.constant 0 : index
    %c0_1 = arith.constant 0 : index
    %c0_2 = arith.constant 0 : index
    %3 = vector.load %arg1[%c0, %c0_1, %c0_2] : memref<2x8x512xbf16, #tpu.memory_space<vmem>>, vector<2x8x512xbf16>
    %4 = arith.extf %3 : vector<2x8x512xbf16> to vector<2x8x512xf32>
    %c0_3 = arith.constant 0 : index
    %c0_4 = arith.constant 0 : index
    %c0_5 = arith.constant 0 : index
    %5 = vector.load %arg9[%c0_3, %c0_4, %c0_5] : memref<2x8x8xf32, #tpu.memory_space<vmem>>, vector<2x8x8xf32>
    %c0_6 = arith.constant 0 : index
    %c0_7 = arith.constant 0 : index
    %c0_8 = arith.constant 0 : index
    %6 = vector.load %arg4[%c0_6, %c0_7, %c0_8] : memref<2x8x512xf32, #tpu.memory_space<vmem>>, vector<2x8x512xf32>
    "tpu.trace_start"() <{level = 10 : i32, message = "bms,bcs->bmc"}> : () -> ()
    %cst = arith.constant dense<0.000000e+00> : vector<2x8x8xf32>
    %7 = tpu.matmul %4, %6, %cst {dimension_numbers = #tpu.dot_dimension_numbers<[2], [2], [1], [1], [0, 0, 0, 1, 1, 1], [0], [0]>} : vector<2x8x512xf32>, vector<2x8x512xf32>, vector<2x8x8xf32> -> vector<2x8x8xf32>
    "tpu.trace_stop"() : () -> ()
    %8 = arith.addf %5, %7 : vector<2x8x8xf32>
    %c0_9 = arith.constant 0 : index
    %c0_10 = arith.constant 0 : index
    %c0_11 = arith.constant 0 : index
    %9 = vector.load %arg9[%c0_9, %c0_10, %c0_11] : memref<2x8x8xf32, #tpu.memory_space<vmem>>, vector<2x8x8xf32>
    tpu.vector_store %arg9[%c0_9, %c0_10, %c0_11], %8 {strides = array<i32>} : memref<2x8x8xf32, #tpu.memory_space<vmem>>, vector<2x8x8xf32>,
    %c0_12 = arith.constant 0 : index
    %c0_13 = arith.constant 0 : index
    %c0_14 = arith.constant 0 : index
    %10 = vector.load %arg10[%c0_12, %c0_13, %c0_14] : memref<2x8x16xf32, #tpu.memory_space<vmem>>, vector<2x8x16xf32>
    %c0_15 = arith.constant 0 : index
    %c0_16 = arith.constant 0 : index
    %c0_17 = arith.constant 0 : index
    %11 = vector.load %arg5[%c0_15, %c0_16, %c0_17] : memref<2x16x512xf32, #tpu.memory_space<vmem>>, vector<2x16x512xf32>
    "tpu.trace_start"() <{level = 10 : i32, message = "bms,bcs->bmc"}> : () -> ()
    %cst_18 = arith.constant dense<0.000000e+00> : vector<2x8x16xf32>
    %12 = tpu.matmul %4, %11, %cst_18 {dimension_numbers = #tpu.dot_dimension_numbers<[2], [2], [1], [1], [0, 0, 0, 1, 1, 1], [0], [0]>} : vector<2x8x512xf32>, vector<2x16x512xf32>, vector<2x8x16xf32> -> vector<2x8x16xf32>
    "tpu.trace_stop"() : () -> ()
    %13 = arith.addf %10, %12 : vector<2x8x16xf32>
    %c0_19 = arith.constant 0 : index
    %c0_20 = arith.constant 0 : index
    %c0_21 = arith.constant 0 : index
    %14 = vector.load %arg10[%c0_19, %c0_20, %c0_21] : memref<2x8x16xf32, #tpu.memory_space<vmem>>, vector<2x8x16xf32>
    tpu.vector_store %arg10[%c0_19, %c0_20, %c0_21], %13 {strides = array<i32>} : memref<2x8x16xf32, #tpu.memory_space<vmem>>, vector<2x8x16xf32>,
    %c0_22 = arith.constant 0 : index
    %c0_23 = arith.constant 0 : index
    %c0_24 = arith.constant 0 : index
    %15 = vector.load %arg11[%c0_22, %c0_23, %c0_24] : memref<2x8x32xf32, #tpu.memory_space<vmem>>, vector<2x8x32xf32>
    %c0_25 = arith.constant 0 : index
    %c0_26 = arith.constant 0 : index
    %c0_27 = arith.constant 0 : index
    %16 = vector.load %arg6[%c0_25, %c0_26, %c0_27] : memref<2x32x512xf32, #tpu.memory_space<vmem>>, vector<2x32x512xf32>
    "tpu.trace_start"() <{level = 10 : i32, message = "bms,bcs->bmc"}> : () -> ()
    %cst_28 = arith.constant dense<0.000000e+00> : vector<2x8x32xf32>
    %17 = tpu.matmul %4, %16, %cst_28 {dimension_numbers = #tpu.dot_dimension_numbers<[2], [2], [1], [1], [0, 0, 0, 1, 1, 1], [0], [0]>} : vector<2x8x512xf32>, vector<2x32x512xf32>, vector<2x8x32xf32> -> vector<2x8x32xf32>
    "tpu.trace_stop"() : () -> ()
    %18 = arith.addf %15, %17 : vector<2x8x32xf32>
    %c0_29 = arith.constant 0 : index
    %c0_30 = arith.constant 0 : index
    %c0_31 = arith.constant 0 : index
    %19 = vector.load %arg11[%c0_29, %c0_30, %c0_31] : memref<2x8x32xf32, #tpu.memory_space<vmem>>, vector<2x8x32xf32>
    tpu.vector_store %arg11[%c0_29, %c0_30, %c0_31], %18 {strides = array<i32>} : memref<2x8x32xf32, #tpu.memory_space<vmem>>, vector<2x8x32xf32>,
    %c0_32 = arith.constant 0 : index
    %c0_33 = arith.constant 0 : index
    %c0_34 = arith.constant 0 : index
    %20 = vector.load %arg12[%c0_32, %c0_33, %c0_34] : memref<2x8x64xf32, #tpu.memory_space<vmem>>, vector<2x8x64xf32>
    %c0_35 = arith.constant 0 : index
    %c0_36 = arith.constant 0 : index
    %c0_37 = arith.constant 0 : index
    %21 = vector.load %arg7[%c0_35, %c0_36, %c0_37] : memref<2x64x512xf32, #tpu.memory_space<vmem>>, vector<2x64x512xf32>
    "tpu.trace_start"() <{level = 10 : i32, message = "bms,bcs->bmc"}> : () -> ()
    %cst_38 = arith.constant dense<0.000000e+00> : vector<2x8x64xf32>
    %22 = tpu.matmul %4, %21, %cst_38 {dimension_numbers = #tpu.dot_dimension_numbers<[2], [2], [1], [1], [0, 0, 0, 1, 1, 1], [0], [0]>} : vector<2x8x512xf32>, vector<2x64x512xf32>, vector<2x8x64xf32> -> vector<2x8x64xf32>
    "tpu.trace_stop"() : () -> ()
    %23 = arith.addf %20, %22 : vector<2x8x64xf32>
    %c0_39 = arith.constant 0 : index
    %c0_40 = arith.constant 0 : index
    %c0_41 = arith.constant 0 : index
    %24 = vector.load %arg12[%c0_39, %c0_40, %c0_41] : memref<2x8x64xf32, #tpu.memory_space<vmem>>, vector<2x8x64xf32>
    tpu.vector_store %arg12[%c0_39, %c0_40, %c0_41], %23 {strides = array<i32>} : memref<2x8x64xf32, #tpu.memory_space<vmem>>, vector<2x8x64xf32>,
    %c1_i32 = arith.constant 1 : i32
    %25 = arith.cmpi eq, %arg0, %c1_i32 : i32
    %26 = arith.extui %25 : i1 to i32
    %c0_i32_42 = arith.constant 0 : i32
    %27 = arith.cmpi ne, %26, %c0_i32_42 : i32
    scf.if %27 {
      %c0_43 = arith.constant 0 : index
      %c0_44 = arith.constant 0 : index
      %28 = vector.load %arg2[%c0_43, %c0_44] : memref<2x8xf32, #tpu.memory_space<vmem>>, vector<2x8xf32>
      %c0_45 = arith.constant 0 : index
      %c0_46 = arith.constant 0 : index
      %29 = vector.load %arg3[%c0_45, %c0_46] : memref<1x4xf32, #tpu.memory_space<vmem>>, vector<1x4xf32>
      %30 = vector.extract_strided_slice %29 {offsets = [0, 0], sizes = [1, 1], strides = [1, 1]} : vector<1x4xf32> to vector<1x1xf32>
      %31 = vector.extract_strided_slice %29 {offsets = [0, 1], sizes = [1, 1], strides = [1, 1]} : vector<1x4xf32> to vector<1x1xf32>
      %32 = vector.extract_strided_slice %29 {offsets = [0, 2], sizes = [1, 1], strides = [1, 1]} : vector<1x4xf32> to vector<1x1xf32>
      %33 = vector.extract_strided_slice %29 {offsets = [0, 3], sizes = [1, 1], strides = [1, 1]} : vector<1x4xf32> to vector<1x1xf32>
      %34 = vector.shape_cast %28 : vector<2x8xf32> to vector<2x8x1xf32>
      %cst_47 = arith.constant 1.000000e+00 : f32
      %35 = vector.broadcast %cst_47 : f32 to vector<2x8x1xf32>
      %36 = arith.addf %34, %35 : vector<2x8x1xf32>
      %cst_48 = arith.constant 1.000000e+00 : f32
      %37 = vector.broadcast %cst_48 : f32 to vector<2x8x1xf32>
      %38 = arith.divf %37, %36 : vector<2x8x1xf32>
      %c0_49 = arith.constant 0 : index
      %c0_50 = arith.constant 0 : index
      %c0_51 = arith.constant 0 : index
      %39 = vector.load %arg9[%c0_49, %c0_50, %c0_51] : memref<2x8x8xf32, #tpu.memory_space<vmem>>, vector<2x8x8xf32>
      %cst_52 = arith.constant 1.000000e+00 : f32
      %40 = vector.broadcast %cst_52 : f32 to vector<2x8x8xf32>
      %41 = arith.addf %39, %40 : vector<2x8x8xf32>
      %42 = vector.broadcast %38 : vector<2x8x1xf32> to vector<2x8x8xf32>
      %43 = arith.mulf %41, %42 : vector<2x8x8xf32>
      %44 = vector.extract_strided_slice %43 {offsets = [0, 1, 0], sizes = [2, 1, 8], strides = [1, 1, 1]} : vector<2x8x8xf32> to vector<2x1x8xf32>
      %45 = vector.broadcast %44 : vector<2x1x8xf32> to vector<2x8x8xf32>
      %46 = arith.mulf %43, %45 : vector<2x8x8xf32>
      %cst_53 = arith.constant dense<0.000000e+00> : vector<2x8xf32>
      %47 = vector.multi_reduction <add>, %46, %cst_53 [2] : vector<2x8x8xf32> to vector<2x8xf32>
      %48 = arith.mulf %43, %43 : vector<2x8x8xf32>
      %cst_54 = arith.constant dense<0.000000e+00> : vector<2x8xf32>
      %49 = vector.multi_reduction <add>, %48, %cst_54 [2] : vector<2x8x8xf32> to vector<2x8xf32>
      %50 = vector.extract_strided_slice %49 {offsets = [0, 1], sizes = [2, 1], strides = [1, 1]} : vector<2x8xf32> to vector<2x1xf32>
      %51 = vector.broadcast %50 : vector<2x1xf32> to vector<2x8xf32>
      %52 = arith.mulf %51, %49 : vector<2x8xf32>
      %cst_55 = arith.constant 9.99999996E-13 : f32
      %53 = vector.broadcast %cst_55 : f32 to vector<2x8xf32>
      %54 = arith.maximumf %52, %53 : vector<2x8xf32>
      %55 = math.rsqrt %54 : vector<2x8xf32>
      %56 = arith.mulf %47, %55 : vector<2x8xf32>
      %cst_56 = arith.constant 2.000000e+00 : f32
      %57 = vector.broadcast %cst_56 : f32 to vector<2x8xf32>
      %58 = arith.mulf %56, %57 : vector<2x8xf32>
      %59 = vector.extract_strided_slice %58 {offsets = [0, 2], sizes = [2, 1], strides = [1, 1]} : vector<2x8xf32> to vector<2x1xf32>
      %60 = vector.broadcast %33 : vector<1x1xf32> to vector<2x1xf32>
      %61 = arith.mulf %59, %60 : vector<2x1xf32>
      %62 = vector.extract_strided_slice %58 {offsets = [0, 3], sizes = [2, 1], strides = [1, 1]} : vector<2x8xf32> to vector<2x1xf32>
      %63 = vector.broadcast %30 : vector<1x1xf32> to vector<2x1xf32>
      %64 = arith.mulf %62, %63 : vector<2x1xf32>
      %65 = arith.addf %61, %64 : vector<2x1xf32>
      %66 = vector.extract_strided_slice %58 {offsets = [0, 4], sizes = [2, 1], strides = [1, 1]} : vector<2x8xf32> to vector<2x1xf32>
      %67 = vector.broadcast %31 : vector<1x1xf32> to vector<2x1xf32>
      %68 = arith.mulf %66, %67 : vector<2x1xf32>
      %69 = arith.addf %65, %68 : vector<2x1xf32>
      %70 = vector.extract_strided_slice %58 {offsets = [0, 5], sizes = [2, 1], strides = [1, 1]} : vector<2x8xf32> to vector<2x1xf32>
      %71 = vector.broadcast %32 : vector<1x1xf32> to vector<2x1xf32>
      %72 = arith.mulf %70, %71 : vector<2x1xf32>
      %73 = arith.addf %69, %72 : vector<2x1xf32>
      %cst_57 = arith.constant 1.000000e-07 : f32
      %74 = vector.broadcast %cst_57 : f32 to vector<2x1xf32>
      %75 = arith.addf %73, %74 : vector<2x1xf32>
      %76 = vector.extract_strided_slice %58 {offsets = [0, 0], sizes = [2, 1], strides = [1, 1]} : vector<2x8xf32> to vector<2x1xf32>
      %77 = arith.divf %76, %75 : vector<2x1xf32>
      %78 = math.log %77 : vector<2x1xf32>
      %cst_58 = arith.constant 0.000000e+00 : f32
      %79 = vector.broadcast %cst_58 : f32 to vector<2x1xf32>
      %80 = arith.subf %79, %78 : vector<2x1xf32>
      %c0_59 = arith.constant 0 : index
      %c0_60 = arith.constant 0 : index
      %81 = vector.load %arg8[%c0_59, %c0_60] : memref<2x4xf32, #tpu.memory_space<vmem>>, vector<2x1xf32>
      tpu.vector_store %arg8[%c0_59, %c0_60], %80 {strides = array<i32>} : memref<2x4xf32, #tpu.memory_space<vmem>>, vector<2x1xf32>,
      %c0_61 = arith.constant 0 : index
      %c0_62 = arith.constant 0 : index
      %c0_63 = arith.constant 0 : index
      %82 = vector.load %arg10[%c0_61, %c0_62, %c0_63] : memref<2x8x16xf32, #tpu.memory_space<vmem>>, vector<2x8x16xf32>
      %cst_64 = arith.constant 1.000000e+00 : f32
      %83 = vector.broadcast %cst_64 : f32 to vector<2x8x16xf32>
      %84 = arith.addf %82, %83 : vector<2x8x16xf32>
      %85 = vector.broadcast %38 : vector<2x8x1xf32> to vector<2x8x16xf32>
      %86 = arith.mulf %84, %85 : vector<2x8x16xf32>
      %87 = vector.extract_strided_slice %86 {offsets = [0, 1, 0], sizes = [2, 1, 16], strides = [1, 1, 1]} : vector<2x8x16xf32> to vector<2x1x16xf32>
      %88 = vector.broadcast %87 : vector<2x1x16xf32> to vector<2x8x16xf32>
      %89 = arith.mulf %86, %88 : vector<2x8x16xf32>
      %cst_65 = arith.constant dense<0.000000e+00> : vector<2x8xf32>
      %90 = vector.multi_reduction <add>, %89, %cst_65 [2] : vector<2x8x16xf32> to vector<2x8xf32>
      %91 = arith.mulf %86, %86 : vector<2x8x16xf32>
      %cst_66 = arith.constant dense<0.000000e+00> : vector<2x8xf32>
      %92 = vector.multi_reduction <add>, %91, %cst_66 [2] : vector<2x8x16xf32> to vector<2x8xf32>
      %93 = vector.extract_strided_slice %92 {offsets = [0, 1], sizes = [2, 1], strides = [1, 1]} : vector<2x8xf32> to vector<2x1xf32>
      %94 = vector.broadcast %93 : vector<2x1xf32> to vector<2x8xf32>
      %95 = arith.mulf %94, %92 : vector<2x8xf32>
      %cst_67 = arith.constant 9.99999996E-13 : f32
      %96 = vector.broadcast %cst_67 : f32 to vector<2x8xf32>
      %97 = arith.maximumf %95, %96 : vector<2x8xf32>
      %98 = math.rsqrt %97 : vector<2x8xf32>
      %99 = arith.mulf %90, %98 : vector<2x8xf32>
      %cst_68 = arith.constant 2.000000e+00 : f32
      %100 = vector.broadcast %cst_68 : f32 to vector<2x8xf32>
      %101 = arith.mulf %99, %100 : vector<2x8xf32>
      %102 = vector.extract_strided_slice %101 {offsets = [0, 2], sizes = [2, 1], strides = [1, 1]} : vector<2x8xf32> to vector<2x1xf32>
      %103 = vector.broadcast %33 : vector<1x1xf32> to vector<2x1xf32>
      %104 = arith.mulf %102, %103 : vector<2x1xf32>
      %105 = vector.extract_strided_slice %101 {offsets = [0, 3], sizes = [2, 1], strides = [1, 1]} : vector<2x8xf32> to vector<2x1xf32>
      %106 = vector.broadcast %30 : vector<1x1xf32> to vector<2x1xf32>
      %107 = arith.mulf %105, %106 : vector<2x1xf32>
      %108 = arith.addf %104, %107 : vector<2x1xf32>
      %109 = vector.extract_strided_slice %101 {offsets = [0, 4], sizes = [2, 1], strides = [1, 1]} : vector<2x8xf32> to vector<2x1xf32>
      %110 = vector.broadcast %31 : vector<1x1xf32> to vector<2x1xf32>
      %111 = arith.mulf %109, %110 : vector<2x1xf32>
      %112 = arith.addf %108, %111 : vector<2x1xf32>
      %113 = vector.extract_strided_slice %101 {offsets = [0, 5], sizes = [2, 1], strides = [1, 1]} : vector<2x8xf32> to vector<2x1xf32>
      %114 = vector.broadcast %32 : vector<1x1xf32> to vector<2x1xf32>
      %115 = arith.mulf %113, %114 : vector<2x1xf32>
      %116 = arith.addf %112, %115 : vector<2x1xf32>
      %cst_69 = arith.constant 1.000000e-07 : f32
      %117 = vector.broadcast %cst_69 : f32 to vector<2x1xf32>
      %118 = arith.addf %116, %117 : vector<2x1xf32>
      %119 = vector.extract_strided_slice %101 {offsets = [0, 0], sizes = [2, 1], strides = [1, 1]} : vector<2x8xf32> to vector<2x1xf32>
      %120 = arith.divf %119, %118 : vector<2x1xf32>
      %121 = math.log %120 : vector<2x1xf32>
      %cst_70 = arith.constant 0.000000e+00 : f32
      %122 = vector.broadcast %cst_70 : f32 to vector<2x1xf32>
      %123 = arith.subf %122, %121 : vector<2x1xf32>
      %c0_71 = arith.constant 0 : index
      %c1 = arith.constant 1 : index
      %124 = vector.load %arg8[%c0_71, %c1] : memref<2x4xf32, #tpu.memory_space<vmem>>, vector<2x1xf32>
      tpu.vector_store %arg8[%c0_71, %c1], %123 {strides = array<i32>} : memref<2x4xf32, #tpu.memory_space<vmem>>, vector<2x1xf32>,
      %c0_72 = arith.constant 0 : index
      %c0_73 = arith.constant 0 : index
      %c0_74 = arith.constant 0 : index
      %125 = vector.load %arg11[%c0_72, %c0_73, %c0_74] : memref<2x8x32xf32, #tpu.memory_space<vmem>>, vector<2x8x32xf32>
      %cst_75 = arith.constant 1.000000e+00 : f32
      %126 = vector.broadcast %cst_75 : f32 to vector<2x8x32xf32>
      %127 = arith.addf %125, %126 : vector<2x8x32xf32>
      %128 = vector.broadcast %38 : vector<2x8x1xf32> to vector<2x8x32xf32>
      %129 = arith.mulf %127, %128 : vector<2x8x32xf32>
      %130 = vector.extract_strided_slice %129 {offsets = [0, 1, 0], sizes = [2, 1, 32], strides = [1, 1, 1]} : vector<2x8x32xf32> to vector<2x1x32xf32>
      %131 = vector.broadcast %130 : vector<2x1x32xf32> to vector<2x8x32xf32>
      %132 = arith.mulf %129, %131 : vector<2x8x32xf32>
      %cst_76 = arith.constant dense<0.000000e+00> : vector<2x8xf32>
      %133 = vector.multi_reduction <add>, %132, %cst_76 [2] : vector<2x8x32xf32> to vector<2x8xf32>
      %134 = arith.mulf %129, %129 : vector<2x8x32xf32>
      %cst_77 = arith.constant dense<0.000000e+00> : vector<2x8xf32>
      %135 = vector.multi_reduction <add>, %134, %cst_77 [2] : vector<2x8x32xf32> to vector<2x8xf32>
      %136 = vector.extract_strided_slice %135 {offsets = [0, 1], sizes = [2, 1], strides = [1, 1]} : vector<2x8xf32> to vector<2x1xf32>
      %137 = vector.broadcast %136 : vector<2x1xf32> to vector<2x8xf32>
      %138 = arith.mulf %137, %135 : vector<2x8xf32>
      %cst_78 = arith.constant 9.99999996E-13 : f32
      %139 = vector.broadcast %cst_78 : f32 to vector<2x8xf32>
      %140 = arith.maximumf %138, %139 : vector<2x8xf32>
      %141 = math.rsqrt %140 : vector<2x8xf32>
      %142 = arith.mulf %133, %141 : vector<2x8xf32>
      %cst_79 = arith.constant 2.000000e+00 : f32
      %143 = vector.broadcast %cst_79 : f32 to vector<2x8xf32>
      %144 = arith.mulf %142, %143 : vector<2x8xf32>
      %145 = vector.extract_strided_slice %144 {offsets = [0, 2], sizes = [2, 1], strides = [1, 1]} : vector<2x8xf32> to vector<2x1xf32>
      %146 = vector.broadcast %33 : vector<1x1xf32> to vector<2x1xf32>
      %147 = arith.mulf %145, %146 : vector<2x1xf32>
      %148 = vector.extract_strided_slice %144 {offsets = [0, 3], sizes = [2, 1], strides = [1, 1]} : vector<2x8xf32> to vector<2x1xf32>
      %149 = vector.broadcast %30 : vector<1x1xf32> to vector<2x1xf32>
      %150 = arith.mulf %148, %149 : vector<2x1xf32>
      %151 = arith.addf %147, %150 : vector<2x1xf32>
      %152 = vector.extract_strided_slice %144 {offsets = [0, 4], sizes = [2, 1], strides = [1, 1]} : vector<2x8xf32> to vector<2x1xf32>
      %153 = vector.broadcast %31 : vector<1x1xf32> to vector<2x1xf32>
      %154 = arith.mulf %152, %153 : vector<2x1xf32>
      %155 = arith.addf %151, %154 : vector<2x1xf32>
      %156 = vector.extract_strided_slice %144 {offsets = [0, 5], sizes = [2, 1], strides = [1, 1]} : vector<2x8xf32> to vector<2x1xf32>
      %157 = vector.broadcast %32 : vector<1x1xf32> to vector<2x1xf32>
      %158 = arith.mulf %156, %157 : vector<2x1xf32>
      %159 = arith.addf %155, %158 : vector<2x1xf32>
      %cst_80 = arith.constant 1.000000e-07 : f32
      %160 = vector.broadcast %cst_80 : f32 to vector<2x1xf32>
      %161 = arith.addf %159, %160 : vector<2x1xf32>
      %162 = vector.extract_strided_slice %144 {offsets = [0, 0], sizes = [2, 1], strides = [1, 1]} : vector<2x8xf32> to vector<2x1xf32>
      %163 = arith.divf %162, %161 : vector<2x1xf32>
      %164 = math.log %163 : vector<2x1xf32>
      %cst_81 = arith.constant 0.000000e+00 : f32
      %165 = vector.broadcast %cst_81 : f32 to vector<2x1xf32>
      %166 = arith.subf %165, %164 : vector<2x1xf32>
      %c0_82 = arith.constant 0 : index
      %c2 = arith.constant 2 : index
      %167 = vector.load %arg8[%c0_82, %c2] : memref<2x4xf32, #tpu.memory_space<vmem>>, vector<2x1xf32>
      tpu.vector_store %arg8[%c0_82, %c2], %166 {strides = array<i32>} : memref<2x4xf32, #tpu.memory_space<vmem>>, vector<2x1xf32>,
      %c0_83 = arith.constant 0 : index
      %c0_84 = arith.constant 0 : index
      %c0_85 = arith.constant 0 : index
      %168 = vector.load %arg12[%c0_83, %c0_84, %c0_85] : memref<2x8x64xf32, #tpu.memory_space<vmem>>, vector<2x8x64xf32>
      %cst_86 = arith.constant 1.000000e+00 : f32
      %169 = vector.broadcast %cst_86 : f32 to vector<2x8x64xf32>
      %170 = arith.addf %168, %169 : vector<2x8x64xf32>
      %171 = vector.broadcast %38 : vector<2x8x1xf32> to vector<2x8x64xf32>
      %172 = arith.mulf %170, %171 : vector<2x8x64xf32>
      %173 = vector.extract_strided_slice %172 {offsets = [0, 1, 0], sizes = [2, 1, 64], strides = [1, 1, 1]} : vector<2x8x64xf32> to vector<2x1x64xf32>
      %174 = vector.broadcast %173 : vector<2x1x64xf32> to vector<2x8x64xf32>
      %175 = arith.mulf %172, %174 : vector<2x8x64xf32>
      %cst_87 = arith.constant dense<0.000000e+00> : vector<2x8xf32>
      %176 = vector.multi_reduction <add>, %175, %cst_87 [2] : vector<2x8x64xf32> to vector<2x8xf32>
      %177 = arith.mulf %172, %172 : vector<2x8x64xf32>
      %cst_88 = arith.constant dense<0.000000e+00> : vector<2x8xf32>
      %178 = vector.multi_reduction <add>, %177, %cst_88 [2] : vector<2x8x64xf32> to vector<2x8xf32>
      %179 = vector.extract_strided_slice %178 {offsets = [0, 1], sizes = [2, 1], strides = [1, 1]} : vector<2x8xf32> to vector<2x1xf32>
      %180 = vector.broadcast %179 : vector<2x1xf32> to vector<2x8xf32>
      %181 = arith.mulf %180, %178 : vector<2x8xf32>
      %cst_89 = arith.constant 9.99999996E-13 : f32
      %182 = vector.broadcast %cst_89 : f32 to vector<2x8xf32>
      %183 = arith.maximumf %181, %182 : vector<2x8xf32>
      %184 = math.rsqrt %183 : vector<2x8xf32>
      %185 = arith.mulf %176, %184 : vector<2x8xf32>
      %cst_90 = arith.constant 2.000000e+00 : f32
      %186 = vector.broadcast %cst_90 : f32 to vector<2x8xf32>
      %187 = arith.mulf %185, %186 : vector<2x8xf32>
      %188 = vector.extract_strided_slice %187 {offsets = [0, 2], sizes = [2, 1], strides = [1, 1]} : vector<2x8xf32> to vector<2x1xf32>
      %189 = vector.broadcast %33 : vector<1x1xf32> to vector<2x1xf32>
      %190 = arith.mulf %188, %189 : vector<2x1xf32>
      %191 = vector.extract_strided_slice %187 {offsets = [0, 3], sizes = [2, 1], strides = [1, 1]} : vector<2x8xf32> to vector<2x1xf32>
      %192 = vector.broadcast %30 : vector<1x1xf32> to vector<2x1xf32>
      %193 = arith.mulf %191, %192 : vector<2x1xf32>
      %194 = arith.addf %190, %193 : vector<2x1xf32>
      %195 = vector.extract_strided_slice %187 {offsets = [0, 4], sizes = [2, 1], strides = [1, 1]} : vector<2x8xf32> to vector<2x1xf32>
      %196 = vector.broadcast %31 : vector<1x1xf32> to vector<2x1xf32>
      %197 = arith.mulf %195, %196 : vector<2x1xf32>
      %198 = arith.addf %194, %197 : vector<2x1xf32>
      %199 = vector.extract_strided_slice %187 {offsets = [0, 5], sizes = [2, 1], strides = [1, 1]} : vector<2x8xf32> to vector<2x1xf32>
      %200 = vector.broadcast %32 : vector<1x1xf32> to vector<2x1xf32>
      %201 = arith.mulf %199, %200 : vector<2x1xf32>
      %202 = arith.addf %198, %201 : vector<2x1xf32>
      %cst_91 = arith.constant 1.000000e-07 : f32
      %203 = vector.broadcast %cst_91 : f32 to vector<2x1xf32>
      %204 = arith.addf %202, %203 : vector<2x1xf32>
      %205 = vector.extract_strided_slice %187 {offsets = [0, 0], sizes = [2, 1], strides = [1, 1]} : vector<2x8xf32> to vector<2x1xf32>
      %206 = arith.divf %205, %204 : vector<2x1xf32>
      %207 = math.log %206 : vector<2x1xf32>
      %cst_92 = arith.constant 0.000000e+00 : f32
      %208 = vector.broadcast %cst_92 : f32 to vector<2x1xf32>
      %209 = arith.subf %208, %207 : vector<2x1xf32>
      %c0_93 = arith.constant 0 : index
      %c3 = arith.constant 3 : index
      %210 = vector.load %arg8[%c0_93, %c3] : memref<2x4xf32, #tpu.memory_space<vmem>>, vector<2x1xf32>
      tpu.vector_store %arg8[%c0_93, %c3], %209 {strides = array<i32>} : memref<2x4xf32, #tpu.memory_space<vmem>>, vector<2x1xf32>,
    } else {
    }
    return
  }
  func.func @transform_0(%arg0: i32) -> (i32, i32, i32) {
    %c0_i32 = arith.constant 0 : i32
    %c0_i32_0 = arith.constant 0 : i32
    %c0_i32_1 = arith.constant 0 : i32
    return %c0_i32, %c0_i32_0, %arg0 : i32, i32, i32
  }
  func.func @transform_1(%arg0: i32) -> (i32, i32) {
    %c0_i32 = arith.constant 0 : i32
    %c0_i32_0 = arith.constant 0 : i32
    %c0_i32_1 = arith.constant 0 : i32
    return %c0_i32, %c0_i32_0 : i32, i32
  }
  func.func @transform_2(%arg0: i32) -> (i32, i32) {
    %c0_i32 = arith.constant 0 : i32
    %c0_i32_0 = arith.constant 0 : i32
    %c0_i32_1 = arith.constant 0 : i32
    return %c0_i32, %c0_i32_0 : i32, i32
  }
  func.func @transform_3(%arg0: i32) -> (i32, i32, i32) {
    %c0_i32 = arith.constant 0 : i32
    %c0_i32_0 = arith.constant 0 : i32
    %c0_i32_1 = arith.constant 0 : i32
    return %c0_i32, %c0_i32_0, %arg0 : i32, i32, i32
  }
  func.func @transform_4(%arg0: i32) -> (i32, i32, i32) {
    %c0_i32 = arith.constant 0 : i32
    %c0_i32_0 = arith.constant 0 : i32
    %c0_i32_1 = arith.constant 0 : i32
    return %c0_i32, %c0_i32_0, %arg0 : i32, i32, i32
  }
  func.func @transform_5(%arg0: i32) -> (i32, i32, i32) {
    %c0_i32 = arith.constant 0 : i32
    %c0_i32_0 = arith.constant 0 : i32
    %c0_i32_1 = arith.constant 0 : i32
    return %c0_i32, %c0_i32_0, %arg0 : i32, i32, i32
  }
  func.func @transform_6(%arg0: i32) -> (i32, i32, i32) {
    %c0_i32 = arith.constant 0 : i32
    %c0_i32_0 = arith.constant 0 : i32
    %c0_i32_1 = arith.constant 0 : i32
    return %c0_i32, %c0_i32_0, %arg0 : i32, i32, i32
  }
  func.func @transform_7(%arg0: i32) -> (i32, i32) {
    %c0_i32 = arith.constant 0 : i32
    %c0_i32_0 = arith.constant 0 : i32
    %c0_i32_1 = arith.constant 0 : i32
    return %c0_i32, %c0_i32_0 : i32, i32
  }
}

</mosaic_0001>

<bundles_post_ra>
// kernel: c2r_forward.1
= control target key start
LH: loop header
LB: loop body
LE: loop exit
PB: predicated region body
PF: predicated region fallthrough
CT: control target
= control target key end

     0   :  { %s2386_s24 = smov 0   ;;  %s2388_s25 = smov 0   ;;  %s3177_s0 = inlined_call_operand.vmem [shape: bf16[2,8,1024], index: 0, kind: input, shape index: {}]   ;;  %s3178_s1 = inlined_call_operand.vmem [shape: f32[2,8], index: 1, kind: input, shape index: {}]   ;;  %s3179_s2 = inlined_call_operand.vmem [shape: f32[1,4], index: 2, kind: input, shape index: {}]   ;;  %s3180_s3 = inlined_call_operand.vmem [shape: f32[2,8,1024], index: 3, kind: input, shape index: {}]   ;;  %s3181_s4 = inlined_call_operand.vmem [shape: f32[2,16,1024], index: 4, kind: input, shape index: {}]   ;;  %s3182_s5 = inlined_call_operand.vmem [shape: f32[2,32,1024], index: 5, kind: input, shape index: {}]   ;;  %s3183_s6 = inlined_call_operand.vmem [shape: f32[2,64,1024], index: 6, kind: input, shape index: {}]   ;;  %s3184_s7 = inlined_call_operand.vmem [shape: f32[2,4], index: 7, kind: output, shape index: {}]  }
   0x1   :  { %s2390_s26 = smov 0  }
   0x2 LB: > { %s2200_s27 = sadd.s32 4294967295, %s2340_s26   ;;  %s2403_s28 = sadd.s32 1, %s2340_s26   ;;  %s2340_s26 = sphi %s2390_s26, %s3200_s26   ;;  %s2336_s25 = sphi %s2388_s25, %s3199_s25   ;;  %s2332_s24 = sphi %s2386_s24, %s3198_s24  }
   0x3   : > { %s21_s29 = ssub.s32 %s2340_s26, %s2403_s28  ;;  %s24_s30 = sadd.s32 1, %s2336_s25 }
   0x4   : > { %p22_p0 = scmp.eq.s32.totalorder %s21_s29, 0  ;;  %p31_p1 = scmp.ne.s32.totalorder %s2336_s25, %s2332_s24 }
   0x5   : > { %p32_p2 = scmp.eq.s32.totalorder %s2340_s26, 0  ;;  %p2202_p4 = scmp.ge.s32.totalorder %s2340_s26, 2 }
   0x6   : > { %s2412_s8 = scalar_select %p22_p0, %s2336_s25, %s24_s30  }
   0x7   : > { %p2414_p3 = por %p32_p2, %p31_p1  ;;  %230 = sbr.rel (%p2202_p4) target bundleno = 156 (0x9c), region = 24 }
   0xc   : > { %233 = sbr.rel (!%p2414_p3) target bundleno = 20 (0x14), region = 28  ;;  %s235_s10 = sand.u32 (%p2414_p3), 1, %s2336_s25  }
   0xd   : > { %s2228_s11 = sshll.u32 (%p2414_p3), %s2340_s26, 4  ;;  %s2203_s12 = sshll.u32 (%p2414_p3), %s235_s10, 5 }
   0xe   : > { %s240_s15 = scalar_lea.vmem (%p2414_p3), %s3177_s0, %s2228_s11  ;;  %s237_s16 = scalar_lea.vmem (%p2414_p3), [#allocation6], %s2203_s12 }
   0xf   : > { %v253_v0 = vld [vmem:[%s240_s15] sm:$0xff] (%p2414_p3)  ;;  %v255_v1 = vld [vmem:[%s240_s15 + $0x8] sm:$0xff] (%p2414_p3) }
  0x10   : > { %v257_v2 = vld [vmem:[%s240_s15 + $0x20] sm:$0xff] (%p2414_p3)  ;;  %254 = vst [vmem:[%s237_s16] sm:$0xff] (%p2414_p3), %v253_v0  ;;  %v259_v3 = vld [vmem:[%s240_s15 + $0x28] sm:$0xff] (%p2414_p3) }
  0x11   : > { %256 = vst [vmem:[%s237_s16 + $0x8] sm:$0xff] %v255_v1 }
  0x12   : > { %258 = vst [vmem:[%s237_s16 + $0x10] sm:$0xff] %v257_v2 }
  0x13   : > { %260 = vst [vmem:[%s237_s16 + $0x18] sm:$0xff] %v259_v3 }
  0x14 PF: > { %266 = sbr.rel (!%p2414_p3) target bundleno = 32 (0x20), region = 51  ;;  %s268_s17 = sand.u32 (%p2414_p3), 1, %s2336_s25  }
  0x15   : > { %s2229_s18 = sshll.u32 (%p2414_p3), %s2340_s26, 5  ;;  %s2206_s19 = sshll.u32 (%p2414_p3), %s268_s17, 6 }
  0x16   : > { %s273_s22 = scalar_lea.vmem (%p2414_p3), %s3180_s3, %s2229_s18  ;;  %s270_s23 = scalar_lea.vmem (%p2414_p3), [#allocation7], %s2206_s19 }
  0x17   : > { %v286_v4 = vld [vmem:[%s273_s22] sm:$0xff] (%p2414_p3)  ;;  %v288_v5 = vld [vmem:[%s273_s22 + $0x8] sm:$0xff] (%p2414_p3)  ;;  %v290_v6 = vld [vmem:[%s273_s22 + $0x10] sm:$0xff] (%p2414_p3) }
  0x18   : > { %287 = vst [vmem:[%s270_s23] sm:$0xff] (%p2414_p3), %v286_v4  ;;  %v292_v7 = vld [vmem:[%s273_s22 + $0x18] sm:$0xff] (%p2414_p3)  ;;  %v294_v8 = vld [vmem:[%s273_s22 + $0x40] sm:$0xff] (%p2414_p3)  ;;  %v296_v9 = vld [vmem:[%s273_s22 + $0x48] sm:$0xff] (%p2414_p3) }
  0x19   : > { %289 = vst [vmem:[%s270_s23 + $0x8] sm:$0xff] %v288_v5  ;;  %v298_v10 = vld [vmem:[%s273_s22 + $0x50] sm:$0xff]  ;;  %v300_v11 = vld [vmem:[%s273_s22 + $0x58] sm:$0xff] }
  0x1a   : > { %291 = vst [vmem:[%s270_s23 + $0x10] sm:$0xff] %v290_v6 }
  0x1b   : > { %293 = vst [vmem:[%s270_s23 + $0x18] sm:$0xff] %v292_v7 }
  0x1c   : > { %295 = vst [vmem:[%s270_s23 + $0x20] sm:$0xff] %v294_v8 }
  0x1d   : > { %297 = vst [vmem:[%s270_s23 + $0x28] sm:$0xff] %v296_v9 }
  0x1e   : > { %299 = vst [vmem:[%s270_s23 + $0x30] sm:$0xff] %v298_v10 }
  0x1f   : > { %301 = vst [vmem:[%s270_s23 + $0x38] sm:$0xff] %v300_v11 }
  0x20 PF: > { %307 = sbr.rel (!%p2414_p3) target bundleno = 52 (0x34), region = 74  ;;  %s309_s29 = sand.u32 (%p2414_p3), 1, %s2336_s25  }
  0x21   : > { %s2230_s30 = sshll.u32 (%p2414_p3), %s2340_s26, 5  ;;  %s2209_s10 = sshll.u32 (%p2414_p3), %s309_s29, 7 }
  0x22   : > { %s2440_s13 = scalar_lea.vmem (%p2414_p3), %s3181_s4, %s2230_s30  ;;  %s311_s14 = scalar_lea.vmem (%p2414_p3), [#allocation8], %s2209_s10 }
  0x23   : > { %v327_v12 = vld [vmem:[%s2440_s13] sm:$0xff] (%p2414_p3)  ;;  %v329_v13 = vld [vmem:[%s2440_s13 + $0x8] sm:$0xff] (%p2414_p3)  ;;  %v331_v14 = vld [vmem:[%s2440_s13 + $0x10] sm:$0xff] (%p2414_p3) }
  0x24   : > { %328 = vst [vmem:[%s311_s14] sm:$0xff] (%p2414_p3), %v327_v12  ;;  %v333_v15 = vld [vmem:[%s2440_s13 + $0x18] sm:$0xff] (%p2414_p3)  ;;  %v335_v16 = vld [vmem:[%s2440_s13 + $0x40] sm:$0xff] (%p2414_p3)  ;;  %v337_v17 = vld [vmem:[%s2440_s13 + $0x48] sm:$0xff] (%p2414_p3) }
  0x25   : > { %330 = vst [vmem:[%s311_s14 + $0x8] sm:$0xff] %v329_v13  ;;  %v339_v18 = vld [vmem:[%s2440_s13 + $0x50] sm:$0xff]  ;;  %v341_v19 = vld [vmem:[%s2440_s13 + $0x58] sm:$0xff]  ;;  %v343_v20 = vld [vmem:[%s2440_s13 + $0x80] sm:$0xff] }
  0x26   : > { %332 = vst [vmem:[%s311_s14 + $0x10] sm:$0xff] %v331_v14  ;;  %v345_v21 = vld [vmem:[%s2440_s13 + $0x88] sm:$0xff]  ;;  %v347_v22 = vld [vmem:[%s2440_s13 + $0x90] sm:$0xff]  ;;  %v349_v23 = vld [vmem:[%s2440_s13 + $0x98] sm:$0xff] }
  0x27   : > { %334 = vst [vmem:[%s311_s14 + $0x18] sm:$0xff] %v333_v15  ;;  %v351_v24 = vld [vmem:[%s2440_s13 + $0xc0] sm:$0xff]  ;;  %v353_v25 = vld [vmem:[%s2440_s13 + $0xc8] sm:$0xff]  ;;  %v355_v26 = vld [vmem:[%s2440_s13 + $0xd0] sm:$0xff] }
  0x28   : > { %336 = vst [vmem:[%s311_s14 + $0x20] sm:$0xff] %v335_v16  ;;  %v357_v27 = vld [vmem:[%s2440_s13 + $0xd8] sm:$0xff] }
  0x29   : > { %338 = vst [vmem:[%s311_s14 + $0x28] sm:$0xff] %v337_v17 }
  0x2a   : > { %340 = vst [vmem:[%s311_s14 + $0x30] sm:$0xff] %v339_v18 }
  0x2b   : > { %342 = vst [vmem:[%s311_s14 + $0x38] sm:$0xff] %v341_v19 }
  0x2c   : > { %344 = vst [vmem:[%s311_s14 + $0x40] sm:$0xff] %v343_v20 }
  0x2d   : > { %346 = vst [vmem:[%s311_s14 + $0x48] sm:$0xff] %v345_v21 }
  0x2e   : > { %348 = vst [vmem:[%s311_s14 + $0x50] sm:$0xff] %v347_v22 }
  0x2f   : > { %350 = vst [vmem:[%s311_s14 + $0x58] sm:$0xff] %v349_v23 }
  0x30   : > { %352 = vst [vmem:[%s311_s14 + $0x60] sm:$0xff] %v351_v24 }
  0x31   : > { %354 = vst [vmem:[%s311_s14 + $0x68] sm:$0xff] %v353_v25 }
  0x32   : > { %356 = vst [vmem:[%s311_s14 + $0x70] sm:$0xff] %v355_v26 }
  0x33   : > { %358 = vst [vmem:[%s311_s14 + $0x78] sm:$0xff] %v357_v27 }
  0x34 PF: > { %364 = sbr.rel (!%p2414_p3) target bundleno = 88 (0x58), region = 97  ;;  %s366_s15 = sand.u32 (%p2414_p3), 1, %s2336_s25  }
  0x35   : > { %s2231_s16 = sshll.u32 (%p2414_p3), %s2340_s26, 5  ;;  %s2212_s17 = sshll.u32 (%p2414_p3), %s366_s15, 8 }
  0x36   : > { %s2465_s20 = scalar_lea.vmem (%p2414_p3), %s3182_s5, %s2231_s16  ;;  %s2470_s21 = scalar_lea.vmem (%p2414_p3), [#allocation9], %s2212_s17 }
  0x37   : > { %v384_v28 = vld [vmem:[%s2465_s20] sm:$0xff] (%p2414_p3)  ;;  %v386_v29 = vld [vmem:[%s2465_s20 + $0x8] sm:$0xff] (%p2414_p3)  ;;  %v388_v30 = vld [vmem:[%s2465_s20 + $0x10] sm:$0xff] (%p2414_p3) }
  0x38   : > { %385 = vst [vmem:[%s2470_s21] sm:$0xff] (%p2414_p3), %v384_v28  ;;  %v390_v31 = vld [vmem:[%s2465_s20 + $0x18] sm:$0xff] (%p2414_p3)  ;;  %v392_v32 = vld [vmem:[%s2465_s20 + $0x40] sm:$0xff] (%p2414_p3)  ;;  %v394_v33 = vld [vmem:[%s2465_s20 + $0x48] sm:$0xff] (%p2414_p3) }
  0x39   : > { %387 = vst [vmem:[%s2470_s21 + $0x8] sm:$0xff] %v386_v29  ;;  %v396_v34 = vld [vmem:[%s2465_s20 + $0x50] sm:$0xff]  ;;  %v398_v35 = vld [vmem:[%s2465_s20 + $0x58] sm:$0xff]  ;;  %v400_v36 = vld [vmem:[%s2465_s20 + $0x80] sm:$0xff] }
  0x3a   : > { %389 = vst [vmem:[%s2470_s21 + $0x10] sm:$0xff] %v388_v30  ;;  %v402_v37 = vld [vmem:[%s2465_s20 + $0x88] sm:$0xff]  ;;  %v404_v38 = vld [vmem:[%s2465_s20 + $0x90] sm:$0xff]  ;;  %v406_v39 = vld [vmem:[%s2465_s20 + $0x98] sm:$0xff] }
  0x3b   : > { %391 = vst [vmem:[%s2470_s21 + $0x18] sm:$0xff] %v390_v31  ;;  %v408_v40 = vld [vmem:[%s2465_s20 + $0xc0] sm:$0xff]  ;;  %v410_v41 = vld [vmem:[%s2465_s20 + $0xc8] sm:$0xff]  ;;  %v412_v42 = vld [vmem:[%s2465_s20 + $0xd0] sm:$0xff] }
  0x3c   : > { %393 = vst [vmem:[%s2470_s21 + $0x20] sm:$0xff] %v392_v32  ;;  %v414_v43 = vld [vmem:[%s2465_s20 + $0xd8] sm:$0xff]  ;;  %v416_v44 = vld [vmem:[%s2465_s20 + $0x100] sm:$0xff]  ;;  %v418_v45 = vld [vmem:[%s2465_s20 + $0x108] sm:$0xff] }
  0x3d   : > { %395 = vst [vmem:[%s2470_s21 + $0x28] sm:$0xff] %v394_v33  ;;  %v420_v46 = vld [vmem:[%s2465_s20 + $0x110] sm:$0xff]  ;;  %v422_v47 = vld [vmem:[%s2465_s20 + $0x118] sm:$0xff]  ;;  %v424_v48 = vld [vmem:[%s2465_s20 + $0x140] sm:$0xff] }
  0x3e   : > { %397 = vst [vmem:[%s2470_s21 + $0x30] sm:$0xff] %v396_v34  ;;  %v426_v49 = vld [vmem:[%s2465_s20 + $0x148] sm:$0xff]  ;;  %v428_v50 = vld [vmem:[%s2465_s20 + $0x150] sm:$0xff]  ;;  %v430_v51 = vld [vmem:[%s2465_s20 + $0x158] sm:$0xff] }
  0x3f   : > { %399 = vst [vmem:[%s2470_s21 + $0x38] sm:$0xff] %v398_v35  ;;  %v432_v52 = vld [vmem:[%s2465_s20 + $0x180] sm:$0xff]  ;;  %v434_v53 = vld [vmem:[%s2465_s20 + $0x188] sm:$0xff]  ;;  %v436_v54 = vld [vmem:[%s2465_s20 + $0x190] sm:$0xff] }
  0x40   : > { %401 = vst [vmem:[%s2470_s21 + $0x40] sm:$0xff] %v400_v36  ;;  %v438_v55 = vld [vmem:[%s2465_s20 + $0x198] sm:$0xff]  ;;  %v440_v56 = vld [vmem:[%s2465_s20 + $0x1c0] sm:$0xff]  ;;  %v442_v57 = vld [vmem:[%s2465_s20 + $0x1c8] sm:$0xff] }
  0x41   : > { %403 = vst [vmem:[%s2470_s21 + $0x48] sm:$0xff] %v402_v37  ;;  %v444_v58 = vld [vmem:[%s2465_s20 + $0x1d0] sm:$0xff]  ;;  %v446_v59 = vld [vmem:[%s2465_s20 + $0x1d8] sm:$0xff] }
  0x42   : > { %405 = vst [vmem:[%s2470_s21 + $0x50] sm:$0xff] %v404_v38 }
  0x43   : > { %407 = vst [vmem:[%s2470_s21 + $0x58] sm:$0xff] %v406_v39 }
  0x44   : > { %409 = vst [vmem:[%s2470_s21 + $0x60] sm:$0xff] %v408_v40 }
  0x45   : > { %411 = vst [vmem:[%s2470_s21 + $0x68] sm:$0xff] %v410_v41 }
  0x46   : > { %413 = vst [vmem:[%s2470_s21 + $0x70] sm:$0xff] %v412_v42 }
  0x47   : > { %415 = vst [vmem:[%s2470_s21 + $0x78] sm:$0xff] %v414_v43 }
  0x48   : > { %417 = vst [vmem:[%s2470_s21 + $0x80] sm:$0xff] %v416_v44 }
  0x49   : > { %419 = vst [vmem:[%s2470_s21 + $0x88] sm:$0xff] %v418_v45 }
  0x4a   : > { %421 = vst [vmem:[%s2470_s21 + $0x90] sm:$0xff] %v420_v46 }
  0x4b   : > { %423 = vst [vmem:[%s2470_s21 + $0x98] sm:$0xff] %v422_v47 }
  0x4c   : > { %425 = vst [vmem:[%s2470_s21 + $0xa0] sm:$0xff] %v424_v48 }
  0x4d   : > { %427 = vst [vmem:[%s2470_s21 + $0xa8] sm:$0xff] %v426_v49 }
  0x4e   : > { %429 = vst [vmem:[%s2470_s21 + $0xb0] sm:$0xff] %v428_v50 }
  0x4f   : > { %431 = vst [vmem:[%s2470_s21 + $0xb8] sm:$0xff] %v430_v51 }
  0x50   : > { %433 = vst [vmem:[%s2470_s21 + $0xc0] sm:$0xff] %v432_v52 }
  0x51   : > { %435 = vst [vmem:[%s2470_s21 + $0xc8] sm:$0xff] %v434_v53 }
  0x52   : > { %437 = vst [vmem:[%s2470_s21 + $0xd0] sm:$0xff] %v436_v54 }
  0x53   : > { %439 = vst [vmem:[%s2470_s21 + $0xd8] sm:$0xff] %v438_v55 }
  0x54   : > { %441 = vst [vmem:[%s2470_s21 + $0xe0] sm:$0xff] %v440_v56 }
  0x55   : > { %443 = vst [vmem:[%s2470_s21 + $0xe8] sm:$0xff] %v442_v57 }
  0x56   : > { %445 = vst [vmem:[%s2470_s21 + $0xf0] sm:$0xff] %v444_v58 }
  0x57   : > { %447 = vst [vmem:[%s2470_s21 + $0xf8] sm:$0xff] %v446_v59 }
  0x58 PF: > { %453 = sbr.rel (!%p2414_p3) target bundleno = 156 (0x9c), region = 120  ;;  %s455_s22 = sand.u32 (%p2414_p3), 1, %s2336_s25  }
  0x59   : > { %s2232_s23 = sshll.u32 (%p2414_p3), %s2340_s26, 5  ;;  %s2215_s29 = sshll.u32 (%p2414_p3), %s455_s22, 9 }
  0x5a   : > { %s2540_s11 = scalar_lea.vmem (%p2414_p3), %s3183_s6, %s2232_s23  ;;  %s2545_s9 = scalar_lea.vmem (%p2414_p3), [#allocation10], %s2215_s29 }
  0x5b   : > { %v473_v60 = vld [vmem:[%s2540_s11] sm:$0xff] (%p2414_p3)  ;;  %v475_v61 = vld [vmem:[%s2540_s11 + $0x8] sm:$0xff] (%p2414_p3)  ;;  %v477_v62 = vld [vmem:[%s2540_s11 + $0x10] sm:$0xff] (%p2414_p3) }
  0x5c   : > { %474 = vst [vmem:[%s2545_s9] sm:$0xff] (%p2414_p3), %v473_v60  ;;  %v479_v63 = vld [vmem:[%s2540_s11 + $0x18] sm:$0xff] (%p2414_p3)  ;;  %v481_v0 = vld [vmem:[%s2540_s11 + $0x40] sm:$0xff] (%p2414_p3)  ;;  %v483_v1 = vld [vmem:[%s2540_s11 + $0x48] sm:$0xff] (%p2414_p3) }
  0x5d   : > { %476 = vst [vmem:[%s2545_s9 + $0x8] sm:$0xff] %v475_v61  ;;  %v485_v2 = vld [vmem:[%s2540_s11 + $0x50] sm:$0xff]  ;;  %v487_v3 = vld [vmem:[%s2540_s11 + $0x58] sm:$0xff]  ;;  %v489_v4 = vld [vmem:[%s2540_s11 + $0x80] sm:$0xff] }
  0x5e   : > { %478 = vst [vmem:[%s2545_s9 + $0x10] sm:$0xff] %v477_v62  ;;  %v491_v5 = vld [vmem:[%s2540_s11 + $0x88] sm:$0xff]  ;;  %v493_v6 = vld [vmem:[%s2540_s11 + $0x90] sm:$0xff]  ;;  %v495_v7 = vld [vmem:[%s2540_s11 + $0x98] sm:$0xff] }
  0x5f   : > { %480 = vst [vmem:[%s2545_s9 + $0x18] sm:$0xff] %v479_v63  ;;  %v497_v8 = vld [vmem:[%s2540_s11 + $0xc0] sm:$0xff]  ;;  %v499_v9 = vld [vmem:[%s2540_s11 + $0xc8] sm:$0xff]  ;;  %v501_v10 = vld [vmem:[%s2540_s11 + $0xd0] sm:$0xff] }
  0x60   : > { %482 = vst [vmem:[%s2545_s9 + $0x20] sm:$0xff] %v481_v0  ;;  %v503_v11 = vld [vmem:[%s2540_s11 + $0xd8] sm:$0xff]  ;;  %v505_v12 = vld [vmem:[%s2540_s11 + $0x100] sm:$0xff]  ;;  %v507_v13 = vld [vmem:[%s2540_s11 + $0x108] sm:$0xff] }
  0x61   : > { %484 = vst [vmem:[%s2545_s9 + $0x28] sm:$0xff] %v483_v1  ;;  %v509_v14 = vld [vmem:[%s2540_s11 + $0x110] sm:$0xff]  ;;  %v511_v15 = vld [vmem:[%s2540_s11 + $0x118] sm:$0xff]  ;;  %v513_v16 = vld [vmem:[%s2540_s11 + $0x140] sm:$0xff] }
  0x62   : > { %486 = vst [vmem:[%s2545_s9 + $0x30] sm:$0xff] %v485_v2  ;;  %v515_v17 = vld [vmem:[%s2540_s11 + $0x148] sm:$0xff]  ;;  %v517_v18 = vld [vmem:[%s2540_s11 + $0x150] sm:$0xff]  ;;  %v519_v19 = vld [vmem:[%s2540_s11 + $0x158] sm:$0xff] }
  0x63   : > { %488 = vst [vmem:[%s2545_s9 + $0x38] sm:$0xff] %v487_v3  ;;  %v521_v20 = vld [vmem:[%s2540_s11 + $0x180] sm:$0xff]  ;;  %v523_v21 = vld [vmem:[%s2540_s11 + $0x188] sm:$0xff]  ;;  %v525_v22 = vld [vmem:[%s2540_s11 + $0x190] sm:$0xff] }
  0x64   : > { %490 = vst [vmem:[%s2545_s9 + $0x40] sm:$0xff] %v489_v4  ;;  %v527_v23 = vld [vmem:[%s2540_s11 + $0x198] sm:$0xff]  ;;  %v529_v24 = vld [vmem:[%s2540_s11 + $0x1c0] sm:$0xff]  ;;  %v531_v25 = vld [vmem:[%s2540_s11 + $0x1c8] sm:$0xff] }
  0x65   : > { %492 = vst [vmem:[%s2545_s9 + $0x48] sm:$0xff] %v491_v5  ;;  %v533_v26 = vld [vmem:[%s2540_s11 + $0x1d0] sm:$0xff]  ;;  %v535_v27 = vld [vmem:[%s2540_s11 + $0x1d8] sm:$0xff]  ;;  %v537_v28 = vld [vmem:[%s2540_s11 + $0x200] sm:$0xff] }
  0x66   : > { %494 = vst [vmem:[%s2545_s9 + $0x50] sm:$0xff] %v493_v6  ;;  %v539_v29 = vld [vmem:[%s2540_s11 + $0x208] sm:$0xff]  ;;  %v541_v30 = vld [vmem:[%s2540_s11 + $0x210] sm:$0xff]  ;;  %v543_v31 = vld [vmem:[%s2540_s11 + $0x218] sm:$0xff] }
  0x67   : > { %496 = vst [vmem:[%s2545_s9 + $0x58] sm:$0xff] %v495_v7  ;;  %v545_v32 = vld [vmem:[%s2540_s11 + $0x240] sm:$0xff]  ;;  %v547_v33 = vld [vmem:[%s2540_s11 + $0x248] sm:$0xff]  ;;  %v549_v34 = vld [vmem:[%s2540_s11 + $0x250] sm:$0xff] }
  0x68   : > { %498 = vst [vmem:[%s2545_s9 + $0x60] sm:$0xff] %v497_v8  ;;  %v551_v35 = vld [vmem:[%s2540_s11 + $0x258] sm:$0xff]  ;;  %v553_v36 = vld [vmem:[%s2540_s11 + $0x280] sm:$0xff]  ;;  %v555_v37 = vld [vmem:[%s2540_s11 + $0x288] sm:$0xff] }
  0x69   : > { %500 = vst [vmem:[%s2545_s9 + $0x68] sm:$0xff] %v499_v9  ;;  %v557_v38 = vld [vmem:[%s2540_s11 + $0x290] sm:$0xff]  ;;  %v559_v39 = vld [vmem:[%s2540_s11 + $0x298] sm:$0xff]  ;;  %v561_v40 = vld [vmem:[%s2540_s11 + $0x2c0] sm:$0xff] }
  0x6a   : > { %502 = vst [vmem:[%s2545_s9 + $0x70] sm:$0xff] %v501_v10  ;;  %v563_v41 = vld [vmem:[%s2540_s11 + $0x2c8] sm:$0xff]  ;;  %v565_v42 = vld [vmem:[%s2540_s11 + $0x2d0] sm:$0xff]  ;;  %v567_v43 = vld [vmem:[%s2540_s11 + $0x2d8] sm:$0xff] }
  0x6b   : > { %504 = vst [vmem:[%s2545_s9 + $0x78] sm:$0xff] %v503_v11  ;;  %v569_v44 = vld [vmem:[%s2540_s11 + $0x300] sm:$0xff]  ;;  %v571_v45 = vld [vmem:[%s2540_s11 + $0x308] sm:$0xff]  ;;  %v573_v46 = vld [vmem:[%s2540_s11 + $0x310] sm:$0xff] }
  0x6c   : > { %506 = vst [vmem:[%s2545_s9 + $0x80] sm:$0xff] %v505_v12  ;;  %v575_v47 = vld [vmem:[%s2540_s11 + $0x318] sm:$0xff]  ;;  %v577_v48 = vld [vmem:[%s2540_s11 + $0x340] sm:$0xff]  ;;  %v579_v49 = vld [vmem:[%s2540_s11 + $0x348] sm:$0xff] }
  0x6d   : > { %508 = vst [vmem:[%s2545_s9 + $0x88] sm:$0xff] %v507_v13  ;;  %v581_v50 = vld [vmem:[%s2540_s11 + $0x350] sm:$0xff]  ;;  %v583_v51 = vld [vmem:[%s2540_s11 + $0x358] sm:$0xff]  ;;  %v585_v52 = vld [vmem:[%s2540_s11 + $0x380] sm:$0xff] }
  0x6e   : > { %510 = vst [vmem:[%s2545_s9 + $0x90] sm:$0xff] %v509_v14  ;;  %v587_v53 = vld [vmem:[%s2540_s11 + $0x388] sm:$0xff]  ;;  %v589_v54 = vld [vmem:[%s2540_s11 + $0x390] sm:$0xff]  ;;  %v591_v55 = vld [vmem:[%s2540_s11 + $0x398] sm:$0xff] }
  0x6f   : > { %512 = vst [vmem:[%s2545_s9 + $0x98] sm:$0xff] %v511_v15  ;;  %v593_v56 = vld [vmem:[%s2540_s11 + $0x3c0] sm:$0xff]  ;;  %v595_v57 = vld [vmem:[%s2540_s11 + $0x3c8] sm:$0xff]  ;;  %v597_v58 = vld [vmem:[%s2540_s11 + $0x3d0] sm:$0xff] }
  0x70   : > { %514 = vst [vmem:[%s2545_s9 + $0xa0] sm:$0xff] %v513_v16  ;;  %v599_v59 = vld [vmem:[%s2540_s11 + $0x3d8] sm:$0xff] }
  0x71   : > { %516 = vst [vmem:[%s2545_s9 + $0xa8] sm:$0xff] %v515_v17 }
  0x72   : > { %518 = vst [vmem:[%s2545_s9 + $0xb0] sm:$0xff] %v517_v18 }
  0x73   : > { %520 = vst [vmem:[%s2545_s9 + $0xb8] sm:$0xff] %v519_v19 }
  0x74   : > { %522 = vst [vmem:[%s2545_s9 + $0xc0] sm:$0xff] %v521_v20 }
  0x75   : > { %524 = vst [vmem:[%s2545_s9 + $0xc8] sm:$0xff] %v523_v21 }
  0x76   : > { %526 = vst [vmem:[%s2545_s9 + $0xd0] sm:$0xff] %v525_v22 }
  0x77   : > { %528 = vst [vmem:[%s2545_s9 + $0xd8] sm:$0xff] %v527_v23 }
  0x78   : > { %530 = vst [vmem:[%s2545_s9 + $0xe0] sm:$0xff] %v529_v24 }
  0x79   : > { %532 = vst [vmem:[%s2545_s9 + $0xe8] sm:$0xff] %v531_v25 }
  0x7a   : > { %534 = vst [vmem:[%s2545_s9 + $0xf0] sm:$0xff] %v533_v26 }
  0x7b   : > { %536 = vst [vmem:[%s2545_s9 + $0xf8] sm:$0xff] %v535_v27 }
  0x7c   : > { %538 = vst [vmem:[%s2545_s9 + $0x100] sm:$0xff] %v537_v28 }
  0x7d   : > { %540 = vst [vmem:[%s2545_s9 + $0x108] sm:$0xff] %v539_v29 }
  0x7e   : > { %542 = vst [vmem:[%s2545_s9 + $0x110] sm:$0xff] %v541_v30 }
  0x7f   : > { %544 = vst [vmem:[%s2545_s9 + $0x118] sm:$0xff] %v543_v31 }
  0x80   : > { %546 = vst [vmem:[%s2545_s9 + $0x120] sm:$0xff] %v545_v32 }
  0x81   : > { %548 = vst [vmem:[%s2545_s9 + $0x128] sm:$0xff] %v547_v33 }
  0x82   : > { %550 = vst [vmem:[%s2545_s9 + $0x130] sm:$0xff] %v549_v34 }
  0x83   : > { %552 = vst [vmem:[%s2545_s9 + $0x138] sm:$0xff] %v551_v35 }
  0x84   : > { %554 = vst [vmem:[%s2545_s9 + $0x140] sm:$0xff] %v553_v36 }
  0x85   : > { %556 = vst [vmem:[%s2545_s9 + $0x148] sm:$0xff] %v555_v37 }
  0x86   : > { %558 = vst [vmem:[%s2545_s9 + $0x150] sm:$0xff] %v557_v38 }
  0x87   : > { %560 = vst [vmem:[%s2545_s9 + $0x158] sm:$0xff] %v559_v39 }
  0x88   : > { %562 = vst [vmem:[%s2545_s9 + $0x160] sm:$0xff] %v561_v40 }
  0x89   : > { %564 = vst [vmem:[%s2545_s9 + $0x168] sm:$0xff] %v563_v41 }
  0x8a   : > { %566 = vst [vmem:[%s2545_s9 + $0x170] sm:$0xff] %v565_v42 }
  0x8b   : > { %568 = vst [vmem:[%s2545_s9 + $0x178] sm:$0xff] %v567_v43 }
  0x8c   : > { %570 = vst [vmem:[%s2545_s9 + $0x180] sm:$0xff] %v569_v44 }
  0x8d   : > { %572 = vst [vmem:[%s2545_s9 + $0x188] sm:$0xff] %v571_v45 }
  0x8e   : > { %574 = vst [vmem:[%s2545_s9 + $0x190] sm:$0xff] %v573_v46 }
  0x8f   : > { %576 = vst [vmem:[%s2545_s9 + $0x198] sm:$0xff] %v575_v47 }
  0x90   : > { %578 = vst [vmem:[%s2545_s9 + $0x1a0] sm:$0xff] %v577_v48 }
  0x91   : > { %580 = vst [vmem:[%s2545_s9 + $0x1a8] sm:$0xff] %v579_v49 }
  0x92   : > { %582 = vst [vmem:[%s2545_s9 + $0x1b0] sm:$0xff] %v581_v50 }
  0x93   : > { %584 = vst [vmem:[%s2545_s9 + $0x1b8] sm:$0xff] %v583_v51 }
  0x94   : > { %586 = vst [vmem:[%s2545_s9 + $0x1c0] sm:$0xff] %v585_v52 }
  0x95   : > { %588 = vst [vmem:[%s2545_s9 + $0x1c8] sm:$0xff] %v587_v53 }
  0x96   : > { %590 = vst [vmem:[%s2545_s9 + $0x1d0] sm:$0xff] %v589_v54 }
  0x97   : > { %592 = vst [vmem:[%s2545_s9 + $0x1d8] sm:$0xff] %v591_v55 }
  0x98   : > { %594 = vst [vmem:[%s2545_s9 + $0x1e0] sm:$0xff] %v593_v56 }
  0x99   : > { %596 = vst [vmem:[%s2545_s9 + $0x1e8] sm:$0xff] %v595_v57 }
  0x9a   : > { %598 = vst [vmem:[%s2545_s9 + $0x1f0] sm:$0xff] %v597_v58 }
  0x9b   : > { %600 = vst [vmem:[%s2545_s9 + $0x1f8] sm:$0xff] %v599_v59 }
  0x9c PF: > { %p2218_p5 = scmp.ge.s32.totalorder %s2340_s26, 1  ;;  %p605_p6 = scmp.lt.s32.totalorder %s2340_s26, 3 }
  0x9e   : > { %p606_p7 = pnand %p2218_p5, %p605_p6 }
  0x9f   : > { %s612_s12 = sand.u32 (!%p606_p7), 1, %s2332_s24   ;;  %p2224_p8 = scmp.ne.s32.totalorder (!%p606_p7), %s2200_s27, 0 }
  0xa0   : > { %609 = sbr.rel (%p606_p7) target bundleno = 947 (0x3b3), region = 143  ;;  %s2219_s13 = sshll.u32 (!%p606_p7), %s612_s12, 5 }
  0xa1   : > { %s2220_s14 = sshll.u32 (!%p606_p7), %s612_s12, 6  ;;  %s2221_s15 = sshll.u32 (!%p606_p7), %s612_s12, 7 }
  0xa2   : > { %s2222_s16 = sshll.u32 (!%p606_p7), %s612_s12, 8  ;;  %s2223_s17 = sshll.u32 (!%p606_p7), %s612_s12, 9 }
  0xa3   : > { %s2675_s18 = scalar_lea.vmem (!%p606_p7), [#allocation6], %s2219_s13  ;;  %s2677_s19 = scalar_lea.vmem (!%p606_p7), [#allocation7], %s2220_s14 }
  0xa4   : > { %s2679_s20 = scalar_lea.vmem (!%p606_p7), [#allocation8], %s2221_s15  ;;  %s2681_s21 = scalar_lea.vmem (!%p606_p7), [#allocation9], %s2222_s16 }
  0xa5   : > { %s2683_s22 = scalar_lea.vmem [#allocation10], %s2223_s17  ;;  %690 = sbr.rel (%p2224_p8) target bundleno = 179 (0xb3), region = 167 }
  0xaa   : > { %vm691_vm0 = vcmask 64512   ;;  %vm694_vm1 = vcmask 130048   ;;  %v2342_v60 = vmov 0.0   ;;  %vm697_vm2 = vcmask 261120  }
  0xab   : > { %692 = vst.msk [vmem:[#allocation2] sm:$0xff] %vm691_vm0, %v2342_v60  ;;  %vm700_vm3 = vcmask 523264  }
  0xac   : > { %693 = vst.msk [vmem:[#allocation2 + $0x8] sm:$0xff] %vm691_vm0, %v2342_v60 }
  0xad   : > { %695 = vst.msk [vmem:[#allocation3] sm:$0xff] %vm694_vm1, %v2342_v60 }
  0xae   : > { %696 = vst.msk [vmem:[#allocation3 + $0x8] sm:$0xff] %vm694_vm1, %v2342_v60 }
  0xaf   : > { %698 = vst.msk [vmem:[#allocation4] sm:$0xff] %vm697_vm2, %v2342_v60 }
  0xb0   : > { %699 = vst.msk [vmem:[#allocation4 + $0x8] sm:$0xff] %vm697_vm2, %v2342_v60 }
  0xb1   : > { %701 = vst.msk [vmem:[#allocation5] sm:$0xff] %vm700_vm3, %v2342_v60 }
  0xb2   : > { %702 = vst.msk [vmem:[#allocation5 + $0x8] sm:$0xff] %vm700_vm3, %v2342_v60 }
  0xb3 PF: > { %v719_v61 = vld [vmem:[%s2677_s19 + $0x10] sm:$0xff]  ;;  %v720_v62 = vld [vmem:[%s2677_s19 + $0x18] sm:$0xff]  ;;  %v704_v63 = vld [vmem:[%s2675_s18 + $0x8] sm:$0xff]  ;;  %vm887_vm4 = vcmask 64512   ;;  %vm1070_vm5 = vcmask 130048   ;;  %vm1269_vm6 = vcmask 261120  }
  0xb4   : > { %780 = vmatpush.xpose.msra.mxu2 %v719_v61  ;;  %800 = vmatpush.xpose.msra.mxu3 %v720_v62  ;;  %v2690_v0 = vunpack.c.l.bf16 %v704_v63  ;;  %v717_v1 = vld [vmem:[%s2677_s19] sm:$0xff]  ;;  %v718_v2 = vld [vmem:[%s2677_s19 + $0x8] sm:$0xff]  ;;  %v2694_v3 = vunpack.c.h.bf16 %v704_v63  ;;  %v723_v7 = vld [vmem:[%s2677_s19 + $0x30] sm:$0xff]  ;;  %vm1500_vm7 = vcmask 523264   ;;  %p2225_p9 = scmp.ne.s32.totalorder %s2200_s27, 1 }
  0xb5   : > { %v703_v4 = vld [vmem:[%s2675_s18] sm:$0xff]  ;;  %740 = vmatpush.xpose.msra.mxu0 %v717_v1  ;;  %760 = vmatpush.xpose.msra.mxu1 %v718_v2  ;;  %v724_v8 = vld [vmem:[%s2677_s19 + $0x38] sm:$0xff]  ;;  %v898_v9 = vld [vmem:[%s2679_s20 + $0x30] sm:$0xff]  ;;  %s2343_s29 = smov (!%p2225_p9), 1   ;;  %s2344_s30 = smov (!%p2225_p9), 2  }
  0xb6   : > { %v2697_v5 = vunpack.c.l.bf16 %v703_v4  ;;  %v2699_v6 = vunpack.c.h.bf16 %v703_v4  ;;  %v899_v10 = vld [vmem:[%s2679_s20 + $0x38] sm:$0xff]  ;;  %v721_v11 = vld [vmem:[%s2677_s19 + $0x20] sm:$0xff]  ;;  %v722_v12 = vld [vmem:[%s2677_s19 + $0x28] sm:$0xff]  ;;  %s2345_s10 = smov (!%p2225_p9), 3  }
  0xb7   : > { %781 = vmatmul.f32.vlgmr.msra.gmra.mxu2 %v2690_v0  ;;  %801 = vmatmul.f32.vlgmr.msra.gmra.mxu3 %v2694_v3  ;;  %v706_v13 = vld [vmem:[%s2675_s18 + $0x18] sm:$0xff]  ;;  %v896_v14 = vld [vmem:[%s2679_s20 + $0x20] sm:$0xff]  ;;  %v897_v15 = vld [vmem:[%s2679_s20 + $0x28] sm:$0xff] }
  0xb8   : > { %860 = vmatpush.xpose.msrb.mxu2 %v723_v7  ;;  %880 = vmatpush.xpose.msrb.mxu3 %v724_v8  ;;  %v705_v16 = vld [vmem:[%s2675_s18 + $0x10] sm:$0xff]  ;;  %v895_v18 = vld [vmem:[%s2679_s20 + $0x18] sm:$0xff]  ;;  %v2717_v19 = vunpack.c.l.bf16 %v706_v13  ;;  %v2719_v20 = vunpack.c.h.bf16 %v706_v13  ;;  %v892_v25 = vld [vmem:[%s2679_s20] sm:$0xff] }
  0xb9   : > { %741 = vmatmul.f32.vlgmr.msra.gmra.mxu0 %v2697_v5  ;;  %761 = vmatmul.f32.vlgmr.msra.gmra.mxu1 %v2699_v6  ;;  %v894_v17 = vld [vmem:[%s2679_s20 + $0x10] sm:$0xff]  ;;  %v2721_v21 = vunpack.c.l.bf16 %v705_v16  ;;  %v2724_v23 = vunpack.c.h.bf16 %v705_v16  ;;  %v907_v24 = vld [vmem:[%s2679_s20 + $0x78] sm:$0xff]  ;;  %v893_v26 = vld [vmem:[%s2679_s20 + $0x8] sm:$0xff] }
  0xba   : > { %820 = vmatpush.xpose.msrb.mxu0 %v721_v11  ;;  %840 = vmatpush.xpose.msrb.mxu1 %v722_v12  ;;  %v906_v22 = vld [vmem:[%s2679_s20 + $0x70] sm:$0xff]  ;;  %v904_v27 = vld [vmem:[%s2679_s20 + $0x60] sm:$0xff]  ;;  %v905_v28 = vld [vmem:[%s2679_s20 + $0x68] sm:$0xff] }
  0xbb   : > { %v902_v29 = vld [vmem:[%s2679_s20 + $0x50] sm:$0xff]  ;;  %v903_v30 = vld [vmem:[%s2679_s20 + $0x58] sm:$0xff]  ;;  %v900_v33 = vld [vmem:[%s2679_s20 + $0x40] sm:$0xff] }
  0xbc   : > { %962 = vmatpush.xpose.msra.mxu2 %v898_v9  ;;  %982 = vmatpush.xpose.msra.mxu3 %v899_v10  ;;  %v1089_v31 = vld [vmem:[%s2681_s21 + $0x70] sm:$0xff]  ;;  %v1090_v32 = vld [vmem:[%s2681_s21 + $0x78] sm:$0xff]  ;;  %v901_v34 = vld [vmem:[%s2679_s20 + $0x48] sm:$0xff] }
  0xbd   : > { %v1087_v35 = vld [vmem:[%s2681_s21 + $0x60] sm:$0xff]  ;;  %v1088_v36 = vld [vmem:[%s2681_s21 + $0x68] sm:$0xff]  ;;  %v1085_v37 = vld [vmem:[%s2681_s21 + $0x50] sm:$0xff] }
  0xbe   : > { %922 = vmatpush.xpose.msra.mxu0 %v896_v14  ;;  %942 = vmatpush.xpose.msra.mxu1 %v897_v15  ;;  %v1086_v38 = vld [vmem:[%s2681_s21 + $0x58] sm:$0xff]  ;;  %v1083_v39 = vld [vmem:[%s2681_s21 + $0x40] sm:$0xff]  ;;  %v1084_v40 = vld [vmem:[%s2681_s21 + $0x48] sm:$0xff] }
  0xbf   : > { %861 = vmatmul.f32.vlgmr.msrb.gmra.mxu2 %v2717_v19  ;;  %881 = vmatmul.f32.vlgmr.msrb.gmra.mxu3 %v2719_v20  ;;  %v1081_v41 = vld [vmem:[%s2681_s21 + $0x30] sm:$0xff]  ;;  %v1082_v42 = vld [vmem:[%s2681_s21 + $0x38] sm:$0xff]  ;;  %v1079_v43 = vld [vmem:[%s2681_s21 + $0x20] sm:$0xff] }
  0xc0   : > { %963 = vmatpush.xpose.msra.mxu2 %v894_v17  ;;  %983 = vmatpush.xpose.msra.mxu3 %v895_v18  ;;  %v1080_v44 = vld [vmem:[%s2681_s21 + $0x28] sm:$0xff]  ;;  %v1077_v45 = vld [vmem:[%s2681_s21 + $0x10] sm:$0xff]  ;;  %v1078_v46 = vld [vmem:[%s2681_s21 + $0x18] sm:$0xff] }
  0xc1   : > { %821 = vmatmul.f32.vlgmr.msrb.gmra.mxu0 %v2721_v21  ;;  %841 = vmatmul.f32.vlgmr.msrb.gmra.mxu1 %v2724_v23  ;;  %v1105_v47 = vld [vmem:[%s2681_s21 + $0xf0] sm:$0xff]  ;;  %v1106_v48 = vld [vmem:[%s2681_s21 + $0xf8] sm:$0xff]  ;;  %v1075_v49 = vld [vmem:[%s2681_s21] sm:$0xff] }
  0xc2   : > { %923 = vmatpush.xpose.msra.mxu0 %v892_v25  ;;  %943 = vmatpush.xpose.msra.mxu1 %v893_v26  ;;  %v1076_v50 = vld [vmem:[%s2681_s21 + $0x8] sm:$0xff]  ;;  %v1103_v51 = vld [vmem:[%s2681_s21 + $0xe0] sm:$0xff]  ;;  %v1101_v53 = vld [vmem:[%s2681_s21 + $0xd0] sm:$0xff] }
  0xc3   : > { %v1104_v52 = vld [vmem:[%s2681_s21 + $0xe8] sm:$0xff]  ;;  %v1102_v54 = vld [vmem:[%s2681_s21 + $0xd8] sm:$0xff]  ;;  %v1099_v55 = vld [vmem:[%s2681_s21 + $0xc0] sm:$0xff] }
  0xc4   : > { %1042 = vmatpush.xpose.msrb.mxu2 %v906_v22  ;;  %1062 = vmatpush.xpose.msrb.mxu3 %v907_v24  ;;  %v1100_v56 = vld [vmem:[%s2681_s21 + $0xc8] sm:$0xff]  ;;  %v1097_v57 = vld [vmem:[%s2681_s21 + $0xb0] sm:$0xff]  ;;  %v1098_v58 = vld [vmem:[%s2681_s21 + $0xb8] sm:$0xff] }
  0xc5   : > { %v1095_v59 = vld [vmem:[%s2681_s21 + $0xa0] sm:$0xff]  ;;  %v1096_v60 = vld [vmem:[%s2681_s21 + $0xa8] sm:$0xff]  ;;  %v1093_v61 = vld [vmem:[%s2681_s21 + $0x90] sm:$0xff] }
  0xc6   : > { %1002 = vmatpush.xpose.msrb.mxu0 %v904_v27  ;;  %1022 = vmatpush.xpose.msrb.mxu1 %v905_v28  ;;  %v1094_v62 = vld [vmem:[%s2681_s21 + $0x98] sm:$0xff]  ;;  %v1304_v63 = vld [vmem:[%s2683_s22 + $0xf0] sm:$0xff]  ;;  %v1091_v2 = vld [vmem:[%s2681_s21 + $0x80] sm:$0xff] }
  0xc7   : > { %964 = vmatmul.f32.vlgmr.msra.gmra.mxu2 %v2690_v0  ;;  %984 = vmatmul.f32.vlgmr.msra.gmra.mxu3 %v2694_v3  ;;  %v1305_v1 = vld [vmem:[%s2683_s22 + $0xf8] sm:$0xff]  ;;  %v1092_v4 = vld [vmem:[%s2681_s21 + $0x88] sm:$0xff]  ;;  %v1302_v7 = vld [vmem:[%s2683_s22 + $0xe0] sm:$0xff] }
  0xc8   : > { %1043 = vmatpush.xpose.msrb.mxu2 %v902_v29  ;;  %1063 = vmatpush.xpose.msrb.mxu3 %v903_v30  ;;  %v1303_v8 = vld [vmem:[%s2683_s22 + $0xe8] sm:$0xff]  ;;  %v1300_v9 = vld [vmem:[%s2683_s22 + $0xd0] sm:$0xff]  ;;  %v1301_v10 = vld [vmem:[%s2683_s22 + $0xd8] sm:$0xff] }
  0xc9   : > { %924 = vmatmul.f32.vlgmr.msra.gmra.mxu0 %v2697_v5  ;;  %944 = vmatmul.f32.vlgmr.msra.gmra.mxu1 %v2699_v6  ;;  %v1298_v11 = vld [vmem:[%s2683_s22 + $0xc0] sm:$0xff]  ;;  %v1299_v12 = vld [vmem:[%s2683_s22 + $0xc8] sm:$0xff]  ;;  %v1296_v13 = vld [vmem:[%s2683_s22 + $0xb0] sm:$0xff] }
  0xca   : > { %1003 = vmatpush.xpose.msrb.mxu0 %v900_v33  ;;  %1023 = vmatpush.xpose.msrb.mxu1 %v901_v34  ;;  %v1297_v14 = vld [vmem:[%s2683_s22 + $0xb8] sm:$0xff]  ;;  %v1294_v15 = vld [vmem:[%s2683_s22 + $0xa0] sm:$0xff]  ;;  %v1295_v16 = vld [vmem:[%s2683_s22 + $0xa8] sm:$0xff] }
  0xcb   : > { %v1292_v17 = vld [vmem:[%s2683_s22 + $0x90] sm:$0xff]  ;;  %v1293_v18 = vld [vmem:[%s2683_s22 + $0x98] sm:$0xff]  ;;  %v1290_v22 = vld [vmem:[%s2683_s22 + $0x80] sm:$0xff] }
  0xcc   : > { %1159 = vmatpush.xpose.msra.mxu2 %v1089_v31  ;;  %1179 = vmatpush.xpose.msra.mxu3 %v1090_v32  ;;  %v1291_v24 = vld [vmem:[%s2683_s22 + $0x88] sm:$0xff]  ;;  %v1288_v25 = vld [vmem:[%s2683_s22 + $0x70] sm:$0xff]  ;;  %v1289_v26 = vld [vmem:[%s2683_s22 + $0x78] sm:$0xff] }
  0xcd   : > { %v1286_v27 = vld [vmem:[%s2683_s22 + $0x60] sm:$0xff]  ;;  %v1287_v28 = vld [vmem:[%s2683_s22 + $0x68] sm:$0xff]  ;;  %v1284_v29 = vld [vmem:[%s2683_s22 + $0x50] sm:$0xff] }
  0xce   : > { %1119 = vmatpush.xpose.msra.mxu0 %v1087_v35  ;;  %1139 = vmatpush.xpose.msra.mxu1 %v1088_v36  ;;  %v1285_v30 = vld [vmem:[%s2683_s22 + $0x58] sm:$0xff]  ;;  %v1282_v31 = vld [vmem:[%s2683_s22 + $0x40] sm:$0xff]  ;;  %v1283_v32 = vld [vmem:[%s2683_s22 + $0x48] sm:$0xff] }
  0xcf   : > { %1044 = vmatmul.f32.vlgmr.msrb.gmra.mxu2 %v2717_v19  ;;  %1064 = vmatmul.f32.vlgmr.msrb.gmra.mxu3 %v2719_v20  ;;  %v1280_v33 = vld [vmem:[%s2683_s22 + $0x30] sm:$0xff]  ;;  %v1281_v34 = vld [vmem:[%s2683_s22 + $0x38] sm:$0xff]  ;;  %v1278_v35 = vld [vmem:[%s2683_s22 + $0x20] sm:$0xff] }
  0xd0   : > { %1160 = vmatpush.xpose.msra.mxu2 %v1085_v37  ;;  %1180 = vmatpush.xpose.msra.mxu3 %v1086_v38  ;;  %v1279_v36 = vld [vmem:[%s2683_s22 + $0x28] sm:$0xff]  ;;  %v1276_v37 = vld [vmem:[%s2683_s22 + $0x10] sm:$0xff]  ;;  %v1277_v38 = vld [vmem:[%s2683_s22 + $0x18] sm:$0xff] }
  0xd1   : > { %1004 = vmatmul.f32.vlgmr.msrb.gmra.mxu0 %v2721_v21  ;;  %1024 = vmatmul.f32.vlgmr.msrb.gmra.mxu1 %v2724_v23 }
  0xd2   : > { %1120 = vmatpush.xpose.msra.mxu0 %v1083_v39  ;;  %1140 = vmatpush.xpose.msra.mxu1 %v1084_v40  ;;  %v1336_v39 = vld [vmem:[%s2683_s22 + $0x1f0] sm:$0xff]  ;;  %v1337_v40 = vld [vmem:[%s2683_s22 + $0x1f8] sm:$0xff] }
  0xd4   : > { %1161 = vmatpush.xpose.msra.mxu2 %v1081_v41  ;;  %1181 = vmatpush.xpose.msra.mxu3 %v1082_v42  ;;  %v1274_v41 = vld [vmem:[%s2683_s22] sm:$0xff]  ;;  %v1275_v42 = vld [vmem:[%s2683_s22 + $0x8] sm:$0xff] }
  0xd6   : > { %1121 = vmatpush.xpose.msra.mxu0 %v1079_v43  ;;  %1141 = vmatpush.xpose.msra.mxu1 %v1080_v44  ;;  %v1334_v43 = vld [vmem:[%s2683_s22 + $0x1e0] sm:$0xff]  ;;  %v1335_v44 = vld [vmem:[%s2683_s22 + $0x1e8] sm:$0xff] }
  0xd8   : > { %1162 = vmatpush.xpose.msra.mxu2 %v1077_v45  ;;  %1182 = vmatpush.xpose.msra.mxu3 %v1078_v46  ;;  %v1332_v45 = vld [vmem:[%s2683_s22 + $0x1d0] sm:$0xff]  ;;  %v1333_v46 = vld [vmem:[%s2683_s22 + $0x1d8] sm:$0xff] }
  0xda   : > { %1122 = vmatpush.xpose.msra.mxu0 %v1075_v49  ;;  %1142 = vmatpush.xpose.msra.mxu1 %v1076_v50  ;;  %v1328_v49 = vld [vmem:[%s2683_s22 + $0x1b0] sm:$0xff]  ;;  %v1329_v50 = vld [vmem:[%s2683_s22 + $0x1b8] sm:$0xff] }
  0xdb   : > { %1163 = vmatmul.f32.vlgmr.msra.gmra.mxu2 %v2690_v0  ;;  %1183 = vmatmul.f32.vlgmr.msra.gmra.mxu3 %v2694_v3 }
  0xdc   : > { %1239 = vmatpush.xpose.msrb.mxu2 %v1105_v47  ;;  %1259 = vmatpush.xpose.msrb.mxu3 %v1106_v48  ;;  %v1330_v47 = vld [vmem:[%s2683_s22 + $0x1c0] sm:$0xff]  ;;  %v1331_v48 = vld [vmem:[%s2683_s22 + $0x1c8] sm:$0xff] }
  0xdd   : > { %1123 = vmatmul.f32.vlgmr.msra.gmra.mxu0 %v2697_v5  ;;  %1143 = vmatmul.f32.vlgmr.msra.gmra.mxu1 %v2699_v6 }
  0xde   : > { %1199 = vmatpush.xpose.msrb.mxu0 %v1103_v51  ;;  %1219 = vmatpush.xpose.msrb.mxu1 %v1104_v52  ;;  %v1326_v51 = vld [vmem:[%s2683_s22 + $0x1a0] sm:$0xff]  ;;  %v1327_v52 = vld [vmem:[%s2683_s22 + $0x1a8] sm:$0xff] }
  0xe0   : > { %1240 = vmatpush.xpose.msrb.mxu2 %v1101_v53  ;;  %1260 = vmatpush.xpose.msrb.mxu3 %v1102_v54  ;;  %v1324_v53 = vld [vmem:[%s2683_s22 + $0x190] sm:$0xff]  ;;  %v1321_v54 = vld [vmem:[%s2683_s22 + $0x178] sm:$0xff] }
  0xe2   : > { %1200 = vmatpush.xpose.msrb.mxu0 %v1099_v55  ;;  %1220 = vmatpush.xpose.msrb.mxu1 %v1100_v56  ;;  %v1318_v55 = vld [vmem:[%s2683_s22 + $0x160] sm:$0xff]  ;;  %v1319_v56 = vld [vmem:[%s2683_s22 + $0x168] sm:$0xff] }
  0xe4   : > { %1241 = vmatpush.xpose.msrb.mxu2 %v1097_v57  ;;  %1261 = vmatpush.xpose.msrb.mxu3 %v1098_v58  ;;  %v1316_v57 = vld [vmem:[%s2683_s22 + $0x150] sm:$0xff]  ;;  %v1317_v58 = vld [vmem:[%s2683_s22 + $0x158] sm:$0xff] }
  0xe6   : > { %1201 = vmatpush.xpose.msrb.mxu0 %v1095_v59  ;;  %1221 = vmatpush.xpose.msrb.mxu1 %v1096_v60  ;;  %v1314_v59 = vld [vmem:[%s2683_s22 + $0x140] sm:$0xff]  ;;  %v1315_v60 = vld [vmem:[%s2683_s22 + $0x148] sm:$0xff] }
  0xe8   : > { %1242 = vmatpush.xpose.msrb.mxu2 %v1093_v61  ;;  %1262 = vmatpush.xpose.msrb.mxu3 %v1094_v62  ;;  %v1312_v61 = vld [vmem:[%s2683_s22 + $0x130] sm:$0xff]  ;;  %v1313_v62 = vld [vmem:[%s2683_s22 + $0x138] sm:$0xff] }
  0xea   : > { %1202 = vmatpush.xpose.msrb.mxu0 %v1091_v2  ;;  %1222 = vmatpush.xpose.msrb.mxu1 %v1092_v4  ;;  %v1308_v2 = vld [vmem:[%s2683_s22 + $0x110] sm:$0xff]  ;;  %v1309_v4 = vld [vmem:[%s2683_s22 + $0x118] sm:$0xff] }
  0xeb   : > { %1243 = vmatmul.f32.vlgmr.msrb.gmra.mxu2 %v2717_v19  ;;  %1263 = vmatmul.f32.vlgmr.msrb.gmra.mxu3 %v2719_v20 }
  0xec   : > { %1386 = vmatpush.xpose.msra.mxu2 %v1304_v63  ;;  %1406 = vmatpush.xpose.msra.mxu3 %v1305_v1  ;;  %v1310_v63 = vld [vmem:[%s2683_s22 + $0x120] sm:$0xff]  ;;  %v1311_v1 = vld [vmem:[%s2683_s22 + $0x128] sm:$0xff] }
  0xed   : > { %1203 = vmatmul.f32.vlgmr.msrb.gmra.mxu0 %v2721_v21  ;;  %1223 = vmatmul.f32.vlgmr.msrb.gmra.mxu1 %v2724_v23 }
  0xee   : > { %1346 = vmatpush.xpose.msra.mxu0 %v1302_v7  ;;  %1366 = vmatpush.xpose.msra.mxu1 %v1303_v8  ;;  %v1306_v7 = vld [vmem:[%s2683_s22 + $0x100] sm:$0xff]  ;;  %v1307_v8 = vld [vmem:[%s2683_s22 + $0x108] sm:$0xff] }
  0xf0   : > { %1387 = vmatpush.xpose.msra.mxu2 %v1300_v9  ;;  %1407 = vmatpush.xpose.msra.mxu3 %v1301_v10 }
  0xf2   : > { %1347 = vmatpush.xpose.msra.mxu0 %v1298_v11  ;;  %1367 = vmatpush.xpose.msra.mxu1 %v1299_v12 }
  0xf4   : > { %1388 = vmatpush.xpose.msra.mxu2 %v1296_v13  ;;  %1408 = vmatpush.xpose.msra.mxu3 %v1297_v14 }
  0xf6   : > { %1348 = vmatpush.xpose.msra.mxu0 %v1294_v15  ;;  %1368 = vmatpush.xpose.msra.mxu1 %v1295_v16  ;;  %v715_v15 = vld [vmem:[#allocation2] sm:$0xff] }
  0xf8   : > { %1389 = vmatpush.xpose.msra.mxu2 %v1292_v17  ;;  %1409 = vmatpush.xpose.msra.mxu3 %v1293_v18 }
  0xfa   : > { %1349 = vmatpush.xpose.msra.mxu0 %v1290_v22  ;;  %1369 = vmatpush.xpose.msra.mxu1 %v1291_v24 }
  0xfc   : > { %1390 = vmatpush.xpose.msra.mxu2 %v1288_v25  ;;  %1410 = vmatpush.xpose.msra.mxu3 %v1289_v26  ;;  %v716_v25 = vld [vmem:[#allocation2 + $0x8] sm:$0xff] }
  0xfe   : > { %1350 = vmatpush.xpose.msra.mxu0 %v1286_v27  ;;  %1370 = vmatpush.xpose.msra.mxu1 %v1287_v28 }
 0x100   : > { %1391 = vmatpush.xpose.msra.mxu2 %v1284_v29  ;;  %1411 = vmatpush.xpose.msra.mxu3 %v1285_v30 }
 0x102   : > { %1351 = vmatpush.xpose.msra.mxu0 %v1282_v31  ;;  %1371 = vmatpush.xpose.msra.mxu1 %v1283_v32 }
 0x104   : > { %1392 = vmatpush.xpose.msra.mxu2 %v1280_v33  ;;  %1412 = vmatpush.xpose.msra.mxu3 %v1281_v34  ;;  %v890_v33 = vld [vmem:[#allocation3] sm:$0xff] }
 0x106   : > { %1352 = vmatpush.xpose.msra.mxu0 %v1278_v35  ;;  %1372 = vmatpush.xpose.msra.mxu1 %v1279_v36 }
 0x108   : > { %1393 = vmatpush.xpose.msra.mxu2 %v1276_v37  ;;  %1413 = vmatpush.xpose.msra.mxu3 %v1277_v38 }
 0x10a   : > { %1353 = vmatpush.xpose.msra.mxu0 %v1274_v41  ;;  %1373 = vmatpush.xpose.msra.mxu1 %v1275_v42  ;;  %v891_v42 = vld [vmem:[#allocation3 + $0x8] sm:$0xff] }
 0x10b   : > { %1394 = vmatmul.f32.vlgmr.msra.gmra.mxu2 %v2690_v0  ;;  %1414 = vmatmul.f32.vlgmr.msra.gmra.mxu3 %v2694_v3  ;;  %v1325_v0 = vld [vmem:[%s2683_s22 + $0x198] sm:$0xff]  ;;  %v1322_v3 = vld [vmem:[%s2683_s22 + $0x180] sm:$0xff] }
 0x10c   : > { %1466 = vmatpush.xpose.msrb.mxu2 %v1336_v39  ;;  %1486 = vmatpush.xpose.msrb.mxu3 %v1337_v40 }
 0x10d   : > { %1354 = vmatmul.f32.vlgmr.msra.gmra.mxu0 %v2697_v5  ;;  %1374 = vmatmul.f32.vlgmr.msra.gmra.mxu1 %v2699_v6  ;;  %v1323_v5 = vld [vmem:[%s2683_s22 + $0x188] sm:$0xff]  ;;  %v1320_v6 = vld [vmem:[%s2683_s22 + $0x170] sm:$0xff] }
 0x10e   : > { %1426 = vmatpush.xpose.msrb.mxu0 %v1334_v43  ;;  %1446 = vmatpush.xpose.msrb.mxu1 %v1335_v44 }
 0x110   : > { %1467 = vmatpush.xpose.msrb.mxu2 %v1332_v45  ;;  %1487 = vmatpush.xpose.msrb.mxu3 %v1333_v46 }
 0x112   : > { %1427 = vmatpush.xpose.msrb.mxu0 %v1330_v47  ;;  %1447 = vmatpush.xpose.msrb.mxu1 %v1331_v48 }
 0x114   : > { %1468 = vmatpush.xpose.msrb.mxu2 %v1328_v49  ;;  %1488 = vmatpush.xpose.msrb.mxu3 %v1329_v50 }
 0x116   : > { %1428 = vmatpush.xpose.msrb.mxu0 %v1326_v51  ;;  %1448 = vmatpush.xpose.msrb.mxu1 %v1327_v52  ;;  %v1073_v51 = vld [vmem:[#allocation4] sm:$0xff] }
 0x118   : > { %1469 = vmatpush.xpose.msrb.mxu2 %v1324_v53  ;;  %1489 = vmatpush.xpose.msrb.mxu3 %v1325_v0 }
 0x11a   : > { %1429 = vmatpush.xpose.msrb.mxu0 %v1322_v3  ;;  %1449 = vmatpush.xpose.msrb.mxu1 %v1323_v5 }
 0x11c   : > { %1470 = vmatpush.xpose.msrb.mxu2 %v1320_v6  ;;  %1490 = vmatpush.xpose.msrb.mxu3 %v1321_v54 }
 0x11e   : > { %1430 = vmatpush.xpose.msrb.mxu0 %v1318_v55  ;;  %1450 = vmatpush.xpose.msrb.mxu1 %v1319_v56  ;;  %v1074_v56 = vld [vmem:[#allocation4 + $0x8] sm:$0xff] }
 0x120   : > { %1471 = vmatpush.xpose.msrb.mxu2 %v1316_v57  ;;  %1491 = vmatpush.xpose.msrb.mxu3 %v1317_v58 }
 0x122   : > { %1431 = vmatpush.xpose.msrb.mxu0 %v1314_v59  ;;  %1451 = vmatpush.xpose.msrb.mxu1 %v1315_v60 }
 0x124   : > { %1472 = vmatpush.xpose.msrb.mxu2 %v1312_v61  ;;  %1492 = vmatpush.xpose.msrb.mxu3 %v1313_v62 }
 0x126   : > { %1432 = vmatpush.xpose.msrb.mxu0 %v1310_v63  ;;  %1452 = vmatpush.xpose.msrb.mxu1 %v1311_v1 }
 0x128   : > { %1473 = vmatpush.xpose.msrb.mxu2 %v1308_v2  ;;  %1493 = vmatpush.xpose.msrb.mxu3 %v1309_v4  ;;  %v1272_v2 = vld [vmem:[#allocation5] sm:$0xff] }
 0x12a   : > { %1433 = vmatpush.xpose.msrb.mxu0 %v1306_v7  ;;  %1453 = vmatpush.xpose.msrb.mxu1 %v1307_v8 }
 0x12b   : > { %1474 = vmatmul.f32.vlgmr.msrb.gmra.mxu2 %v2717_v19  ;;  %1494 = vmatmul.f32.vlgmr.msrb.gmra.mxu3 %v2719_v20 }
 0x12d   : > { %1434 = vmatmul.f32.vlgmr.msrb.gmra.mxu0 %v2721_v21  ;;  %1454 = vmatmul.f32.vlgmr.msrb.gmra.mxu1 %v2724_v23 }
 0x136   : > { %v742_v9 = vpop.f32.mrf.mxu0  ;;  %v762_v10 = vpop.f32.mrf.mxu1 }
 0x137   : > { %v763_v11 = vadd.f32 %v762_v10, %v742_v9 }
 0x13a   : > { %v782_v12 = vpop.f32.mrf.mxu2  ;;  %v802_v13 = vpop.f32.mrf.mxu3 }
 0x13b   : > { %v783_v14 = vadd.f32 %v782_v12, %v763_v11 }
 0x13d   : > { %v803_v16 = vadd.f32 %v802_v13, %v783_v14  ;;  %v1273_v14 = vld [vmem:[#allocation5 + $0x8] sm:$0xff] }
 0x13e   : > { %v822_v17 = vpop.f32.mrf.mxu0  ;;  %v842_v18 = vpop.f32.mrf.mxu1 }
 0x13f   : > { %v885_v19 = vadd.f32 %v803_v16, %v715_v15  ;;  %v843_v22 = vadd.f32 %v842_v18, %v822_v17 }
 0x141   : > { %888 = vst.msk [vmem:[#allocation2] sm:$0xff] %vm887_vm4, %v885_v19 }
 0x142   : > { %v862_v20 = vpop.f32.mrf.mxu2  ;;  %v882_v24 = vpop.f32.mrf.mxu3 }
 0x143   : > { %v863_v21 = vadd.f32 %v862_v20, %v843_v22 }
 0x145   : > { %v883_v23 = vadd.f32 %v882_v24, %v863_v21 }
 0x146   : > { %v925_v27 = vpop.f32.mrf.mxu0  ;;  %v945_v28 = vpop.f32.mrf.mxu1 }
 0x147   : > { %v886_v26 = vadd.f32 %v883_v23, %v716_v25  ;;  %v946_v29 = vadd.f32 %v945_v28, %v925_v27 }
 0x149   : > { %889 = vst.msk [vmem:[#allocation2 + $0x8] sm:$0xff] %vm887_vm4, %v886_v26 }
 0x14a   : > { %v965_v30 = vpop.f32.mrf.mxu2  ;;  %v985_v31 = vpop.f32.mrf.mxu3 }
 0x14b   : > { %v966_v32 = vadd.f32 %v965_v30, %v946_v29 }
 0x14d   : > { %v986_v34 = vadd.f32 %v985_v31, %v966_v32 }
 0x14e   : > { %v1005_v36 = vpop.f32.mrf.mxu0  ;;  %v1025_v37 = vpop.f32.mrf.mxu1 }
 0x14f   : > { %v1068_v35 = vadd.f32 %v986_v34, %v890_v33  ;;  %v1026_v38 = vadd.f32 %v1025_v37, %v1005_v36 }
 0x151   : > { %1071 = vst.msk [vmem:[#allocation3] sm:$0xff] %vm1070_vm5, %v1068_v35 }
 0x152   : > { %v1045_v39 = vpop.f32.mrf.mxu2  ;;  %v1065_v40 = vpop.f32.mrf.mxu3 }
 0x153   : > { %v1046_v41 = vadd.f32 %v1045_v39, %v1026_v38 }
 0x155   : > { %v1066_v43 = vadd.f32 %v1065_v40, %v1046_v41 }
 0x157   : > { %v1069_v46 = vadd.f32 %v1066_v43, %v891_v42 }
 0x159   : > { %1072 = vst.msk [vmem:[#allocation3 + $0x8] sm:$0xff] %vm1070_vm5, %v1069_v46 }
 0x15a   : > { %v1124_v44 = vpop.f32.mrf.mxu0  ;;  %v1144_v45 = vpop.f32.mrf.mxu1 }
 0x15b   : > { %v1145_v47 = vadd.f32 %v1144_v45, %v1124_v44 }
 0x15e   : > { %v1164_v48 = vpop.f32.mrf.mxu2  ;;  %v1184_v49 = vpop.f32.mrf.mxu3 }
 0x15f   : > { %v1165_v50 = vadd.f32 %v1164_v48, %v1145_v47 }
 0x161   : > { %v1185_v52 = vadd.f32 %v1184_v49, %v1165_v50 }
 0x163   : > { %v1267_v53 = vadd.f32 %v1185_v52, %v1073_v51 }
 0x165   : > { %1270 = vst.msk [vmem:[#allocation4] sm:$0xff] %vm1269_vm6, %v1267_v53 }
 0x16a   : > { %v1204_v0 = vpop.f32.mrf.mxu0  ;;  %v1224_v3 = vpop.f32.mrf.mxu1 }
 0x16b   : > { %v1225_v5 = vadd.f32 %v1224_v3, %v1204_v0 }
 0x16e   : > { %v1244_v6 = vpop.f32.mrf.mxu2  ;;  %v1264_v54 = vpop.f32.mrf.mxu3 }
 0x16f   : > { %v1245_v55 = vadd.f32 %v1244_v6, %v1225_v5 }
 0x171   : > { %v1265_v57 = vadd.f32 %v1264_v54, %v1245_v55 }
 0x173   : > { %v1268_v58 = vadd.f32 %v1265_v57, %v1074_v56 }
 0x175   : > { %1271 = vst.msk [vmem:[#allocation4 + $0x8] sm:$0xff] %vm1269_vm6, %v1268_v58 }
 0x18a   : > { %v1355_v59 = vpop.f32.mrf.mxu0  ;;  %v1375_v60 = vpop.f32.mrf.mxu1 }
 0x18b   : > { %v1376_v61 = vadd.f32 %v1375_v60, %v1355_v59 }
 0x18e   : > { %v1395_v62 = vpop.f32.mrf.mxu2  ;;  %v1415_v63 = vpop.f32.mrf.mxu3 }
 0x18f   : > { %v1396_v1 = vadd.f32 %v1395_v62, %v1376_v61 }
 0x191   : > { %v1416_v4 = vadd.f32 %v1415_v63, %v1396_v1 }
 0x193   : > { %v1498_v7 = vadd.f32 %v1416_v4, %v1272_v2 }
 0x195   : > { %1501 = vst.msk [vmem:[#allocation5] sm:$0xff] %vm1500_vm7, %v1498_v7 }
 0x1aa   : > { %v1435_v8 = vpop.f32.mrf.mxu0  ;;  %v1455_v9 = vpop.f32.mrf.mxu1 }
 0x1ab   : > { %v1456_v10 = vadd.f32 %v1455_v9, %v1435_v8 }
 0x1ae   : > { %v1475_v11 = vpop.f32.mrf.mxu2  ;;  %v1495_v13 = vpop.f32.mrf.mxu3 }
 0x1af   : > { %v1476_v12 = vadd.f32 %v1475_v11, %v1456_v10 }
 0x1b1   : > { %v1496_v15 = vadd.f32 %v1495_v13, %v1476_v12  ;;  %1506 = sbr.rel (%p2225_p9) target bundleno = 947 (0x3b3), region = 171 }
 0x1b3   : > { %v1499_v16 = vadd.f32 %v1496_v15, %v1273_v14 }
 0x1b5   : > { %1502 = vst.msk [vmem:[#allocation5 + $0x8] sm:$0xff] %vm1500_vm7, %v1499_v16 }
 0x1b6   : > { %v1510_v17 = vlaneseq  ;;  %v1507_v19 = vld [vmem:[%s3178_s1] sm:$0x3]  ;;  %v1702_v30 = vld [vmem:[#allocation3 + $0x8] sm:$0xff]  ;;  %v1833_v37 = vld [vmem:[#allocation4 + $0x8] sm:$0xff] }
 0x1b7   : > { %v1516_v22 = vperm.slane %v1507_v19, 1  ;;  %v1509_v20 = vperm.slane %v1507_v19, 0  ;;  %v1704_v34 = vadd.f32 1.0, %v1702_v30  ;;  %v1835_v43 = vadd.f32 1.0, %v1833_v37  ;;  %v1832_v44 = vld [vmem:[#allocation4] sm:$0xff]  ;;  %v1701_v45 = vld [vmem:[#allocation3] sm:$0xff] }
 0x1b8   : > { %v2869_v18 = vshrl.u32 %v1510_v17, 7  ;;  %v1834_v50 = vadd.f32 1.0, %v1832_v44  ;;  %v1703_v51 = vadd.f32 1.0, %v1701_v45  ;;  %v1556_v3 = vld [vmem:[#allocation2 + $0x8] sm:$0xff]  ;;  %v1963_v6 = vld [vmem:[#allocation5] sm:$0xff] }
 0x1b9   : > { %v1558_v57 = vadd.f32 1.0, %v1556_v3  ;;  %v1965_v61 = vadd.f32 1.0, %v1963_v6 }
 0x1ba   : > { %2261 = vset.pattern.permute.xlu0 %v2869_v18  ;;  %v1622_v11 = vadd.s32 4294967293, %v2869_v18  ;;  %v1613_v12 = vadd.s32 1, %v2869_v18 }
 0x1bc   : > { %v1964_v55 = vld [vmem:[#allocation5 + $0x8] sm:$0xff]  ;;  %2262 = vset.pattern.permute.xlu2 %v1622_v11  ;;  %2263 = vset.pattern.permute.xlu1 %v1613_v12 }
 0x1bd   : > { %v1966_v62 = vadd.f32 1.0, %v1964_v55 }
 0x1c2   : > { %1521 = vperm.xlu0 %2261, %v1516_v22  }
 0x1ca   : > { %1514 = vperm.xlu0 %2261, %v1509_v20  }
 0x1d2   : > { %2264 = vset.pattern.permute.xlu0 %v1622_v11 }
 0x234   : > { %v1522_v24 = vpop.permute.xlu0 %1521 }
 0x235   : > { %v1524_v21 = vadd.f32 1.0, %v1522_v24 }
 0x237   : > { %2266 = vrcp.f32 %v1524_v21  ;;  %v1551_v29 = vand.u32 2147483648, %v1524_v21  ;;  %v1549_v32 = vand.u32 2147483647, %v1524_v21  ;;  %vm1545_vm9 = vweird.f32 %v1524_v21 }
 0x239   : > { %v1552_v36 = vor.u32 1.1754944e-38, %v1551_v29  ;;  %vm1550_vm11 = vcmp.eq.f32.partialorder %v1549_v32, 8.507059e+37 }
 0x23c   : > { %v1515_v25 = vpop.permute.xlu0 %1514 }
 0x23d   : > { %v2267_v23 = vpop.eup %2266  ;;  %v1523_v26 = vadd.f32 1.0, %v1515_v25 }
 0x23e   : > { %v1541_v27 = vmul.f32 %v2267_v23, %v1524_v21  ;;  %vm1546_vm8 = vweird.f32 %v2267_v23 }
 0x23f   : > { %2268 = vrcp.f32 %v1523_v26  ;;  %vm1547_vm10 = vmor %vm1545_vm9, %vm1546_vm8  ;;  %v1536_v46 = vand.u32 2147483648, %v1523_v26  ;;  %v1534_v49 = vand.u32 2147483647, %v1523_v26  ;;  %vm1530_vm13 = vweird.f32 %v1523_v26 }
 0x240   : > { %v1542_v28 = vsub.f32 1.0, %v1541_v27 }
 0x241   : > { %v1537_v5 = vor.u32 1.1754944e-38, %v1536_v46  ;;  %vm1535_vm15 = vcmp.eq.f32.partialorder %v1534_v49, 8.507059e+37 }
 0x242   : > { %v1543_v31 = vmul.f32 %v2267_v23, %v1542_v28 }
 0x244   : > { %v1544_v33 = vadd.f32 %v2267_v23, %v1543_v31 }
 0x245   : > { %v2269_v35 = vpop.eup %2268 }
 0x246   : > { %v1526_v38 = vmul.f32 %v2269_v35, %v1523_v26  ;;  %v1548_v39 = vsel %vm1547_vm10, %v2267_v23, %v1544_v33  ;;  %vm1531_vm12 = vweird.f32 %v2269_v35 }
 0x247   : > { %v1553_v40 = vsel %vm1550_vm11, %v1552_v36, %v1548_v39  ;;  %vm1532_vm14 = vmor %vm1530_vm13, %vm1531_vm12 }
 0x248   : > { %v1527_v41 = vsub.f32 1.0, %v1526_v38  ;;  %v1706_v42 = vmul.f32 %v1704_v34, %v1553_v40  ;;  %v1837_v53 = vmul.f32 %v1835_v43, %v1553_v40  ;;  %v1560_v2 = vmul.f32 %v1558_v57, %v1553_v40 }
 0x249   : > { %v1968_v10 = vmul.f32 %v1966_v62, %v1553_v40  ;;  %v2265_v40 = vld [vmem:[%s3179_s2] ss:$0 sm:$0xff] }
 0x24a   : > { %v1528_v47 = vmul.f32 %v2269_v35, %v1527_v41  ;;  %v1718_v48 = vmul.f32 %v1706_v42, %v1706_v42  ;;  %v1849_v58 = vmul.f32 %v1837_v53, %v1837_v53  ;;  %v1572_v14 = vmul.f32 %v1560_v2, %v1560_v2  ;;  %v1555_v41 = vld [vmem:[#allocation2] sm:$0xff] }
 0x24b   : > { %v1980_v15 = vmul.f32 %v1968_v10, %v1968_v10  ;;  %v1839_v19 = vperm.slane %v1837_v53, 1  ;;  %v1562_v22 = vperm.slane %v1560_v2, 1  ;;  %v1708_v24 = vperm.slane %v1706_v42, 1 }
 0x24c   : > { %v1722_v52 = vsel %vm1070_vm5, %v1718_v48, 0.0  ;;  %v1529_v0 = vadd.f32 %v2269_v35, %v1528_v47  ;;  %v1853_v4 = vsel %vm1269_vm6, %v1849_v58, 0.0  ;;  %v1576_v17 = vsel %vm887_vm4, %v1572_v14, 0.0 }
 0x24d   : > { %1723 = vadd.xlane.f32.xlu1 %v1722_v52  ;;  %v1984_v20 = vsel %vm1500_vm7, %v1980_v15, 0.0  ;;  %v1841_v21 = vmul.f32 %v1839_v19, %v1837_v53  ;;  %v1564_v18 = vmul.f32 %v1562_v22, %v1560_v2  ;;  %v1710_v25 = vmul.f32 %v1708_v24, %v1706_v42 }
 0x24e   : > { %v1533_v54 = vsel %vm1532_vm14, %v2269_v35, %v1529_v0  ;;  %v1970_v27 = vperm.slane %v1968_v10, 1  ;;  %v1557_v42 = vadd.f32 1.0, %v1555_v41 }
 0x24f   : > { %v2876_v56 = vsel %vm1535_vm15, %v1537_v5, %v1533_v54  ;;  %v1845_v23 = vsel %vm1269_vm6, %v1841_v21, 0.0  ;;  %v1568_v26 = vsel %vm887_vm4, %v1564_v18, 0.0  ;;  %v1714_v28 = vsel %vm1070_vm5, %v1710_v25, 0.0 }
 0x250   : > { %v1836_v59 = vmul.f32 %v1834_v50, %v2876_v56  ;;  %v1705_v60 = vmul.f32 %v1703_v51, %v2876_v56  ;;  %v1967_v9 = vmul.f32 %v1965_v61, %v2876_v56  ;;  %v1972_v30 = vmul.f32 %v1970_v27, %v1968_v10 }
 0x251   : > { %v1559_v43 = vmul.f32 %v1557_v42, %v2876_v56 }
 0x252   : > { %v1848_v63 = vmul.f32 %v1836_v59, %v1836_v59  ;;  %v1717_v1 = vmul.f32 %v1705_v60, %v1705_v60  ;;  %v1979_v13 = vmul.f32 %v1967_v9, %v1967_v9  ;;  %v1707_v29 = vperm.slane %v1705_v60, 1 }
 0x253   : > { %v1976_v32 = vsel %vm1500_vm7, %v1972_v30, 0.0  ;;  %v1969_v33 = vperm.slane %v1967_v9, 1  ;;  %v1838_v35 = vperm.slane %v1836_v59, 1  ;;  %v1561_v44 = vperm.slane %v1559_v43, 1 }
 0x254   : > { %v1850_v7 = vsel %vm1269_vm6, %v1848_v63, 0.0  ;;  %v1719_v8 = vsel %vm1070_vm5, %v1717_v1, 0.0  ;;  %v1981_v16 = vsel %vm1500_vm7, %v1979_v13, 0.0  ;;  %v1709_v31 = vmul.f32 %v1707_v29, %v1705_v60 }
 0x255   : > { %1854 = vadd.xlane.f32.xlu1 %v1853_v4  ;;  %1851 = vadd.xlane.f32.xlu0 %v1850_v7  ;;  %v1971_v36 = vmul.f32 %v1969_v33, %v1967_v9  ;;  %v1840_v37 = vmul.f32 %v1838_v35, %v1836_v59  ;;  %v1571_v45 = vmul.f32 %v1559_v43, %v1559_v43 }
 0x256   : > { %1720 = vadd.xlane.f32.xlu2 %v1719_v8  ;;  %v1711_v34 = vsel %vm1070_vm5, %v1709_v31, 0.0  ;;  %v1563_v46 = vmul.f32 %v1561_v44, %v1559_v43 }
 0x257   : > { %v1973_v38 = vsel %vm1500_vm7, %v1971_v36, 0.0  ;;  %v1842_v39 = vsel %vm1269_vm6, %v1840_v37, 0.0  ;;  %v1573_v47 = vsel %vm887_vm4, %v1571_v45, 0.0 }
 0x258   : > { %v1565_v48 = vsel %vm887_vm4, %v1563_v46, 0.0 }
 0x25d   : > { %1982 = vadd.xlane.f32.xlu1 %v1981_v16  ;;  %1577 = vadd.xlane.f32.xlu0 %v1576_v17 }
 0x25e   : > { %1985 = vadd.xlane.f32.xlu2 %v1984_v20 }
 0x265   : > { %1846 = vadd.xlane.f32.xlu1 %v1845_v23  ;;  %1569 = vadd.xlane.f32.xlu0 %v1568_v26 }
 0x266   : > { %1715 = vadd.xlane.f32.xlu2 %v1714_v28 }
 0x26d   : > { %1977 = vadd.xlane.f32.xlu1 %v1976_v32 }
 0x26e   : > { %1712 = vadd.xlane.f32.xlu2 %v1711_v34 }
 0x275   : > { %1974 = vadd.xlane.f32.xlu1 %v1973_v38 }
 0x276   : > { %1843 = vadd.xlane.f32.xlu2 %v1842_v39 }
 0x28e   : > { %1624 = vperm.xlu2 %2262, %v2265_v40   ;;  %1615 = vperm.xlu1 %2263, %v2265_v40  }
 0x2b7   : > { %1574 = vadd.xlane.f32.xlu2 %v1573_v47 }
 0x2b8   : > { %1566 = vadd.xlane.f32.xlu1 %v1565_v48 }
 0x2c0   : > { %v1724_v49 = vpop.xlane.xlu1 %1723 }
 0x2c1   : > { %v1726_v50 = vperm.slane %v1724_v49, 1 }
 0x2c3   : > { %v1728_v6 = vmul.f32 %v1726_v50, %v1724_v49 }
 0x2c5   : > { %v2902_v57 = vmax.f32 %v1728_v6, 1e-12 }
 0x2c7   : > { %2270 = vrsqrt.f32 %v2902_v57  ;;  %vm1747_vm3 = vweird.f32 %v2902_v57 }
 0x2c8   : > { %v1855_v51 = vpop.xlane.xlu1 %1854  ;;  %v1852_v52 = vpop.xlane.xlu0 %1851 }
 0x2c9   : > { %v1857_v53 = vperm.slane %v1855_v51, 1  ;;  %v1721_v0 = vpop.xlane.xlu2 %1720  ;;  %v1856_v3 = vperm.slane %v1852_v52, 1 }
 0x2ca   : > { %v1725_v5 = vperm.slane %v1721_v0, 1 }
 0x2cb   : > { %v1859_v55 = vmul.f32 %v1857_v53, %v1855_v51  ;;  %v1858_v56 = vmul.f32 %v1856_v3, %v1852_v52 }
 0x2cc   : > { %v1727_v54 = vmul.f32 %v1725_v5, %v1721_v0 }
 0x2cd   : > { %v2906_v60 = vmax.f32 %v1859_v55, 1e-12  ;;  %v2908_v63 = vmax.f32 %v1858_v56, 1e-12  ;;  %v2919_v11 = vpop.eup %2270 }
 0x2ce   : > { %v2904_v58 = vmax.f32 %v1727_v54, 1e-12  ;;  %v1742_v16 = vmul.f32 %v2919_v11, %v2902_v57  ;;  %vm1748_vm0 = vweird.f32 %v2919_v11 }
 0x2cf   : > { %vm1878_vm4 = vweird.f32 %v2906_v60  ;;  %vm2967_vm5 = vmor %vm1747_vm3, %vm1748_vm0  ;;  %vm1868_vm7 = vweird.f32 %v2908_v63 }
 0x2d0   : > { %v1983_v59 = vpop.xlane.xlu1 %1982  ;;  %2272 = vrsqrt.f32 %v2904_v58  ;;  %v1578_v8 = vpop.xlane.xlu0 %1577  ;;  %v1743_v21 = vmul.f32 %v2919_v11, %v1742_v16  ;;  %vm1737_vm6 = vweird.f32 %v2904_v58 }
 0x2d1   : > { %v1987_v61 = vperm.slane %v1983_v59, 1  ;;  %v1986_v62 = vpop.xlane.xlu2 %1985  ;;  %2274 = vrsqrt.f32 %v2906_v60  ;;  %v1580_v10 = vperm.slane %v1578_v8, 1 }
 0x2d2   : > { %v1988_v1 = vperm.slane %v1986_v62, 1  ;;  %2276 = vrsqrt.f32 %v2908_v63  ;;  %v1744_v33 = vmul.f32 0.5, %v1743_v21 }
 0x2d3   : > { %v1989_v2 = vmul.f32 %v1987_v61, %v1983_v59  ;;  %v1582_v17 = vmul.f32 %v1580_v10, %v1578_v8 }
 0x2d4   : > { %v1990_v4 = vmul.f32 %v1988_v1, %v1986_v62  ;;  %v1745_v37 = vsub.f32 1.5, %v1744_v33 }
 0x2d5   : > { %v2913_v7 = vmax.f32 %v1989_v2, 1e-12  ;;  %v2945_v23 = vmax.f32 %v1582_v17, 1e-12 }
 0x2d6   : > { %v2916_v9 = vmax.f32 %v1990_v4, 1e-12  ;;  %v2924_v13 = vpop.eup %2272  ;;  %v1746_v45 = vmul.f32 %v2919_v11, %v1745_v37 }
 0x2d7   : > { %2278 = vrsqrt.f32 %v2913_v7  ;;  %v2926_v14 = vpop.eup %2274  ;;  %v1732_v22 = vmul.f32 %v2924_v13, %v2904_v58  ;;  %vm1738_vm1 = vweird.f32 %v2924_v13  ;;  %vm1999_vm13 = vweird.f32 %v2913_v7 }
 0x2d8   : > { %2280 = vrsqrt.f32 %v2916_v9  ;;  %v2928_v15 = vpop.eup %2276  ;;  %v1873_v20 = vmul.f32 %v2926_v14, %v2906_v60  ;;  %v1847_v26 = vpop.xlane.xlu1 %1846  ;;  %vm1879_vm2 = vweird.f32 %v2926_v14  ;;  %v1750_v0 = vsel %vm2967_vm5, %v2919_v11, %v1746_v45  ;;  %vm2977_vm9 = vmor %vm1737_vm6, %vm1738_vm1 }
 0x2d9   : > { %v2922_v12 = vpop.xlane.xlu2 %1715  ;;  %v1863_v18 = vmul.f32 %v2928_v15, %v2908_v63  ;;  %v1733_v27 = vmul.f32 %v2924_v13, %v1732_v22  ;;  %2282 = vrsqrt.f32 %v2945_v23  ;;  %vm1869_vm8 = vweird.f32 %v2928_v15  ;;  %vm1880_vm11 = vmor %vm1878_vm4, %vm1879_vm2 }
 0x2da   : > { %v1874_v29 = vmul.f32 %v2926_v14, %v1873_v20  ;;  %vm1870_vm14 = vmor %vm1868_vm7, %vm1869_vm8  ;;  %vm2009_vm15 = vweird.f32 %v2916_v9  ;;  %v1752_v58 = vmul.f32 %v1750_v0, %v2922_v12  ;;  %vm1601_vm3 = vweird.f32 %v2945_v23 }
 0x2db   : > { %v1864_v31 = vmul.f32 %v2928_v15, %v1863_v18  ;;  %v1734_v35 = vmul.f32 0.5, %v1733_v27 }
 0x2dc   : > { %v1875_v36 = vmul.f32 0.5, %v1874_v29  ;;  %v2999_v10 = vmul.f32 2.0, %v1752_v58 }
 0x2dd   : > { %v2932_v19 = vpop.eup %2278  ;;  %v1865_v39 = vmul.f32 0.5, %v1864_v31  ;;  %v1735_v41 = vsub.f32 1.5, %v1734_v35 }
 0x2de   : > { %v2938_v24 = vpop.eup %2280  ;;  %v1994_v25 = vmul.f32 %v2932_v19, %v2913_v7  ;;  %v1876_v43 = vsub.f32 1.5, %v1875_v36  ;;  %vm2000_vm10 = vweird.f32 %v2932_v19 }
 0x2df   : > { %v2004_v28 = vmul.f32 %v2938_v24, %v2916_v9  ;;  %v2955_v42 = vpop.eup %2282  ;;  %v1866_v47 = vsub.f32 1.5, %v1865_v39  ;;  %v1736_v50 = vmul.f32 %v2924_v13, %v1735_v41  ;;  %vm2010_vm12 = vweird.f32 %v2938_v24  ;;  %vm2001_vm0 = vmor %vm1999_vm13, %vm2000_vm10 }
 0x2e0   : > { %v1995_v32 = vmul.f32 %v2932_v19, %v1994_v25  ;;  %v1978_v44 = vpop.xlane.xlu1 %1977  ;;  %v1596_v48 = vmul.f32 %v2955_v42, %v2945_v23  ;;  %v1877_v52 = vmul.f32 %v2926_v14, %v1876_v43  ;;  %vm2011_vm1 = vmor %vm2009_vm15, %vm2010_vm12  ;;  %vm1602_vm2 = vweird.f32 %v2955_v42 }
 0x2e1   : > { %v1713_v30 = vpop.xlane.xlu2 %1712  ;;  %v2005_v34 = vmul.f32 %v2938_v24, %v2004_v28  ;;  %v1867_v6 = vmul.f32 %v2928_v15, %v1866_v47  ;;  %v1740_v56 = vsel %vm2977_vm9, %v2924_v13, %v1736_v50  ;;  %vm1603_vm4 = vmor %vm1601_vm3, %vm1602_vm2 }
 0x2e2   : > { %v1996_v38 = vmul.f32 0.5, %v1995_v32  ;;  %v1597_v54 = vmul.f32 %v2955_v42, %v1596_v48  ;;  %v1881_v57 = vsel %vm1880_vm11, %v2926_v14, %v1877_v52  ;;  %v1751_v59 = vmul.f32 %v1740_v56, %v1713_v30 }
 0x2e3   : > { %v2006_v40 = vmul.f32 0.5, %v2005_v34  ;;  %v1871_v62 = vsel %vm1870_vm14, %v2928_v15, %v1867_v6  ;;  %v1883_v63 = vmul.f32 %v1881_v57, %v1847_v26 }
 0x2e4   : > { %v1997_v46 = vsub.f32 1.5, %v1996_v38  ;;  %v1598_v1 = vmul.f32 0.5, %v1597_v54  ;;  %v3001_v11 = vmul.f32 2.0, %v1751_v59 }
 0x2e5   : > { %v2007_v49 = vsub.f32 1.5, %v2006_v40  ;;  %v3003_v12 = vmul.f32 2.0, %v1883_v63 }
 0x2e6   : > { %v1998_v5 = vmul.f32 %v2932_v19, %v1997_v46  ;;  %v1599_v13 = vsub.f32 1.5, %v1598_v1 }
 0x2e7   : > { %v2008_v55 = vmul.f32 %v2938_v24, %v2007_v49 }
 0x2e8   : > { %v2002_v60 = vsel %vm2001_vm0, %v2932_v19, %v1998_v5  ;;  %v1975_v61 = vpop.xlane.xlu1 %1974 }
 0x2e9   : > { %v1844_v51 = vpop.xlane.xlu2 %1843  ;;  %v2012_v2 = vsel %vm2011_vm1, %v2938_v24, %v2008_v55  ;;  %v2013_v8 = vmul.f32 %v2002_v60, %v1975_v61  ;;  %v1600_v24 = vmul.f32 %v2955_v42, %v1599_v13 }
 0x2ea   : > { %v1882_v4 = vmul.f32 %v1871_v62, %v1844_v51  ;;  %v2014_v9 = vmul.f32 %v2012_v2, %v1978_v44 }
 0x2eb   : > { %v3011_v17 = vmul.f32 2.0, %v2013_v8 }
 0x2ec   : > { %v3005_v14 = vmul.f32 2.0, %v1882_v4  ;;  %v3017_v20 = vmul.f32 2.0, %v2014_v9  ;;  %v1604_v4 = vsel %vm1603_vm4, %v2955_v42, %v1600_v24 }
 0x2f1   : > { %v2997_v7 = vpop.permute.xlu2 %1624 }
 0x2f2   : > { %v1757_v15 = vmul.f32 %v3001_v11, %v2997_v7  ;;  %v1758_v16 = vmul.f32 %v2999_v10, %v2997_v7  ;;  %v1888_v19 = vmul.f32 %v3005_v14, %v2997_v7  ;;  %v1889_v22 = vmul.f32 %v3003_v12, %v2997_v7 }
 0x2f3   : > { %v2019_v21 = vmul.f32 %v3011_v17, %v2997_v7  ;;  %v2020_v27 = vmul.f32 %v3017_v20, %v2997_v7 }
 0x2f4   : > { %v1767_v18 = vrot.slane %v1757_v15, 2  ;;  %v1768_v25 = vrot.slane %v1758_v16, 2  ;;  %v1773_v26 = vrot.slane %v1757_v15, 3  ;;  %v1774_v28 = vrot.slane %v1758_v16, 3 }
 0x2f5   : > { %v1898_v29 = vrot.slane %v1888_v19, 2  ;;  %v1899_v30 = vrot.slane %v1889_v22, 2  ;;  %v1904_v31 = vrot.slane %v1888_v19, 3  ;;  %v1761_v33 = vrot.slane %v1757_v15, 1 }
 0x2f6   : > { %v1762_v34 = vrot.slane %v1758_v16, 1  ;;  %v1892_v35 = vrot.slane %v1888_v19, 1  ;;  %v1893_v36 = vrot.slane %v1889_v22, 1  ;;  %v2023_v40 = vrot.slane %v2019_v21, 1 }
 0x2f7   : > { %v2024_v45 = vrot.slane %v2020_v27, 1  ;;  %v2029_v46 = vrot.slane %v2019_v21, 2  ;;  %v2030_v50 = vrot.slane %v2020_v27, 2  ;;  %v1905_v0 = vrot.slane %v1889_v22, 3  ;;  %v1570_v22 = vpop.xlane.xlu0 %1569 }
 0x2f8   : > { %v2035_v54 = vrot.slane %v2019_v21, 3  ;;  %v2036_v61 = vrot.slane %v2020_v27, 3  ;;  %v1606_v21 = vmul.f32 %v1604_v4, %v1570_v22 }
 0x2fa   : > { %v3056_v24 = vmul.f32 2.0, %v1606_v21 }
 0x300   : > { %v3025_v32 = vpop.permute.xlu1 %1615 }
 0x301   : > { %v1755_v37 = vmul.f32 %v3001_v11, %v3025_v32  ;;  %v1756_v38 = vmul.f32 %v2999_v10, %v3025_v32  ;;  %v1886_v39 = vmul.f32 %v3005_v14, %v3025_v32  ;;  %v1887_v41 = vmul.f32 %v3003_v12, %v3025_v32 }
 0x302   : > { %v2017_v43 = vmul.f32 %v3011_v17, %v3025_v32  ;;  %v2018_v44 = vmul.f32 %v3017_v20, %v3025_v32 }
 0x303   : > { %v1765_v47 = vadd.f32 %v1761_v33, %v1755_v37  ;;  %v1766_v48 = vadd.f32 %v1762_v34, %v1756_v38  ;;  %v1896_v49 = vadd.f32 %v1892_v35, %v1886_v39  ;;  %v1897_v51 = vadd.f32 %v1893_v36, %v1887_v41 }
 0x304   : > { %v2027_v52 = vadd.f32 %v2023_v40, %v2017_v43  ;;  %v2028_v53 = vadd.f32 %v2024_v45, %v2018_v44 }
 0x305   : > { %v1771_v3 = vadd.f32 %v1767_v18, %v1765_v47  ;;  %v1772_v5 = vadd.f32 %v1768_v25, %v1766_v48  ;;  %v1902_v6 = vadd.f32 %v1898_v29, %v1896_v49  ;;  %v1903_v55 = vadd.f32 %v1899_v30, %v1897_v51 }
 0x306   : > { %v2033_v56 = vadd.f32 %v2029_v46, %v2027_v52  ;;  %v2034_v57 = vadd.f32 %v2030_v50, %v2028_v53 }
 0x307   : > { %v1777_v58 = vadd.f32 %v1773_v26, %v1771_v3  ;;  %v1778_v59 = vadd.f32 %v1774_v28, %v1772_v5  ;;  %v1908_v60 = vadd.f32 %v1904_v31, %v1902_v6  ;;  %v1909_v62 = vadd.f32 %v1905_v0, %v1903_v55 }
 0x308   : > { %v2039_v63 = vadd.f32 %v2035_v54, %v2033_v56  ;;  %v2040_v8 = vadd.f32 %v2036_v61, %v2034_v57  ;;  %v3067_v31 = vmul.f32 %v2997_v7, %v3056_v24 }
 0x309   : > { %v1779_v1 = vadd.f32 1e-07, %v1777_v58  ;;  %v1780_v2 = vadd.f32 1e-07, %v1778_v59  ;;  %v1910_v9 = vadd.f32 1e-07, %v1908_v60 }
 0x30a   : > { %v1911_v13 = vadd.f32 1e-07, %v1909_v62  ;;  %v2041_v19 = vadd.f32 1e-07, %v2039_v63  ;;  %v2042_v25 = vadd.f32 1e-07, %v2040_v8 }
 0x30b   : > { %v3043_v15 = vrot.slane %v1779_v1, 2  ;;  %v3045_v16 = vrot.slane %v1780_v2, 2  ;;  %v3047_v23 = vrot.slane %v1910_v9, 2 }
 0x30c   : > { %v3049_v18 = vrot.slane %v1911_v13, 2  ;;  %v3053_v42 = vrot.slane %v2041_v19, 2  ;;  %v3063_v30 = vrot.slane %v2042_v25, 2 }
 0x30d   : > { %2284 = vrcp.f32 %v3043_v15  ;;  %v1796_v26 = vand.u32 2147483647, %v3043_v15  ;;  %v1798_v27 = vand.u32 2147483648, %v3043_v15  ;;  %v1811_v28 = vand.u32 2147483647, %v3045_v16 }
 0x30e   : > { %2286 = vrcp.f32 %v3045_v16  ;;  %v1813_v29 = vand.u32 2147483648, %v3045_v16  ;;  %vm1792_vm5 = vweird.f32 %v3043_v15  ;;  %v1929_v33 = vand.u32 2147483648, %v3047_v23 }
 0x30f   : > { %2288 = vrcp.f32 %v3047_v23  ;;  %v1927_v35 = vand.u32 2147483647, %v3047_v23  ;;  %v1942_v36 = vand.u32 2147483647, %v3049_v18  ;;  %v1944_v37 = vand.u32 2147483648, %v3049_v18 }
 0x310   : > { %2290 = vrcp.f32 %v3049_v18  ;;  %vm3077_vm6 = vcmp.eq.f32.partialorder %v1796_v26, 8.507059e+37  ;;  %v1799_v41 = vor.u32 1.1754944e-38, %v1798_v27  ;;  %vm1807_vm7 = vweird.f32 %v3045_v16 }
 0x311   : > { %2292 = vrcp.f32 %v3053_v42  ;;  %vm3083_vm8 = vcmp.eq.f32.partialorder %v1811_v28, 8.507059e+37  ;;  %v1814_v46 = vor.u32 1.1754944e-38, %v1813_v29  ;;  %vm1923_vm9 = vweird.f32 %v3047_v23 }
 0x312   : > { %2294 = vrcp.f32 %v3063_v30  ;;  %v1930_v50 = vor.u32 1.1754944e-38, %v1929_v33  ;;  %vm1938_vm10 = vweird.f32 %v3049_v18  ;;  %vm3090_vm12 = vcmp.eq.f32.partialorder %v1927_v35, 8.507059e+37 }
 0x313   : > { %v2285_v34 = vpop.eup %2284  ;;  %vm3095_vm13 = vcmp.eq.f32.partialorder %v1942_v36, 8.507059e+37  ;;  %v1945_v3 = vor.u32 1.1754944e-38, %v1944_v37  ;;  %v2073_v55 = vand.u32 2147483647, %v3063_v30  ;;  %v2075_v4 = vand.u32 2147483648, %v3063_v30 }
 0x314   : > { %v2287_v38 = vpop.eup %2286  ;;  %v1788_v39 = vmul.f32 %v2285_v34, %v3043_v15  ;;  %vm1793_vm11 = vweird.f32 %v2285_v34  ;;  %v2058_v37 = vand.u32 2147483647, %v3053_v42 }
 0x315   : > { %v2289_v43 = vpop.eup %2288  ;;  %v1803_v44 = vmul.f32 %v2287_v38, %v3045_v16  ;;  %vm1808_vm14 = vweird.f32 %v2287_v38  ;;  %vm1794_vm1 = vmor %vm1792_vm5, %vm1793_vm11 }
 0x316   : > { %v2291_v47 = vpop.eup %2290  ;;  %v1789_v48 = vsub.f32 1.0, %v1788_v39  ;;  %v1919_v49 = vmul.f32 %v2289_v43, %v3047_v23  ;;  %vm1924_vm15 = vweird.f32 %v2289_v43  ;;  %vm1809_vm2 = vmor %vm1807_vm7, %vm1808_vm14  ;;  %vm2069_vm7 = vweird.f32 %v3063_v30 }
 0x317   : > { %v1804_v51 = vsub.f32 1.0, %v1803_v44  ;;  %v1934_v53 = vmul.f32 %v2291_v47, %v3049_v18  ;;  %v3099_v5 = vpop.eup %2292  ;;  %vm1939_vm0 = vweird.f32 %v2291_v47  ;;  %vm1925_vm4 = vmor %vm1923_vm9, %vm1924_vm15  ;;  %vm2054_vm9 = vweird.f32 %v3053_v42 }
 0x318   : > { %v1790_v6 = vmul.f32 %v2285_v34, %v1789_v48  ;;  %v1920_v54 = vsub.f32 1.0, %v1919_v49  ;;  %v2295_v56 = vpop.eup %2294  ;;  %v2050_v59 = vmul.f32 %v3099_v5, %v3053_v42  ;;  %vm1940_vm5 = vmor %vm1938_vm10, %vm1939_vm0  ;;  %vm2074_vm10 = vcmp.eq.f32.partialorder %v2073_v55, 8.507059e+37 }
 0x319   : > { %v1805_v57 = vmul.f32 %v2287_v38, %v1804_v51  ;;  %v1935_v58 = vsub.f32 1.0, %v1934_v53  ;;  %v2065_v62 = vmul.f32 %v2295_v56, %v3063_v30  ;;  %vm2070_vm3 = vweird.f32 %v2295_v56 }
 0x31a   : > { %v1791_v60 = vadd.f32 %v2285_v34, %v1790_v6  ;;  %v1921_v61 = vmul.f32 %v2289_v43, %v1920_v54  ;;  %v2051_v2 = vsub.f32 1.0, %v2050_v59  ;;  %v2060_v30 = vand.u32 2147483648, %v3053_v42 }
 0x31b   : > { %v1806_v63 = vadd.f32 %v2287_v38, %v1805_v57  ;;  %v1936_v1 = vmul.f32 %v2291_v47, %v1935_v58  ;;  %v2066_v13 = vsub.f32 1.0, %v2065_v62  ;;  %v1644_v55 = vrot.slane %v3067_v31, 3 }
 0x31c   : > { %v1795_v8 = vsel %vm1794_vm1, %v2285_v34, %v1791_v60  ;;  %v1922_v9 = vadd.f32 %v2289_v43, %v1921_v61  ;;  %v2052_v21 = vmul.f32 %v3099_v5, %v2051_v2  ;;  %v2061_v44 = vor.u32 1.1754944e-38, %v2060_v30 }
 0x31d   : > { %v1800_v19 = vsel %vm3077_vm6, %v1799_v41, %v1795_v8  ;;  %v1810_v22 = vsel %vm1809_vm2, %v2287_v38, %v1806_v63  ;;  %v1937_v15 = vadd.f32 %v2291_v47, %v1936_v1  ;;  %v2067_v27 = vmul.f32 %v2295_v56, %v2066_v13 }
 0x31e   : > { %v1801_v25 = vmul.f32 %v1800_v19, %v3001_v11  ;;  %v1815_v16 = vsel %vm3083_vm8, %v1814_v46, %v1810_v22  ;;  %v1926_v26 = vsel %vm1925_vm4, %v2289_v43, %v1922_v9  ;;  %vm2055_vm6 = vweird.f32 %v3099_v5  ;;  %vm2071_vm8 = vmor %vm2069_vm7, %vm2070_vm3 }
 0x31f   : > { %v1816_v28 = vmul.f32 %v1815_v16, %v2999_v10  ;;  %v1941_v29 = vsel %vm1940_vm5, %v2291_v47, %v1937_v15  ;;  %v1931_v11 = vsel %vm3090_vm12, %v1930_v50, %v1926_v26  ;;  %v2068_v33 = vadd.f32 %v2295_v56, %v2067_v27  ;;  %vm2056_vm11 = vmor %vm2054_vm9, %vm2055_vm6 }
 0x320   : > { %2296 = vlog2.f32 %v1801_v25  ;;  %v1946_v23 = vsel %vm3095_vm13, %v1945_v3, %v1941_v29  ;;  %v2053_v34 = vadd.f32 %v3099_v5, %v2052_v21  ;;  %v2076_v10 = vor.u32 1.1754944e-38, %v2075_v4 }
 0x321   : > { %2298 = vlog2.f32 %v1816_v28  ;;  %v1947_v18 = vmul.f32 %v1946_v23, %v3003_v12  ;;  %v2072_v35 = vsel %vm2071_vm8, %v2295_v56, %v2068_v33  ;;  %v1932_v36 = vmul.f32 %v1931_v11, %v3005_v14 }
 0x322   : > { %v2077_v38 = vsel %vm2074_vm10, %v2076_v10, %v2072_v35  ;;  %v1619_v12 = vmul.f32 %v3025_v32, %v3056_v24  ;;  %v2057_v39 = vsel %vm2056_vm11, %v3099_v5, %v2053_v34  ;;  %v1632_v43 = vrot.slane %v3067_v31, 1 }
 0x323   : > { %2300 = vlog2.f32 %v1947_v18  ;;  %v2078_v40 = vmul.f32 %v2077_v38, %v3017_v20  ;;  %vm2059_vm12 = vcmp.eq.f32.partialorder %v2058_v37, 8.507059e+37  ;;  %v1638_v50 = vrot.slane %v3067_v31, 2 }
 0x324   : > { %2302 = vlog2.f32 %v1932_v36  ;;  %v1636_v14 = vadd.f32 %v1632_v43, %v1619_v12  ;;  %v2062_v47 = vsel %vm2059_vm12, %v2061_v44, %v2057_v39  ;;  %vm1696_vm13 = vcmask 1041409  }
 0x325   : > { %2304 = vlog2.f32 %v2078_v40  ;;  %v2063_v20 = vmul.f32 %v2062_v47, %v3011_v17  ;;  %vm1699_vm9 = vcmask 1024   ;;  %vm1830_vm10 = vcmask 9224  }
 0x326   : > { %v2297_v41 = vpop.eup %2296  ;;  %v1642_v0 = vadd.f32 %v1638_v50, %v1636_v14  ;;  %vm1961_vm11 = vcmask 17424   ;;  %vm2092_vm12 = vcmask 25624  }
 0x327   : > { %v2299_v45 = vpop.eup %2298  ;;  %v1818_v42 = vmul.f32 0.6931472, %v2297_v41  ;;  %2306 = vlog2.f32 %v2063_v20 }
 0x328   : > { %v1820_v46 = vmul.f32 0.6931472, %v2299_v45  ;;  %v1648_v60 = vadd.f32 %v1644_v55, %v1642_v0 }
 0x329   : > { %v2301_v48 = vpop.eup %2300  ;;  %v1821_v5 = vsub.f32 0.0, %v1818_v42 }
 0x32a   : > { %v1575_v49 = vpop.xlane.xlu2 %1574  ;;  %v1822_v52 = vsub.f32 0.0, %v1820_v46  ;;  %v1951_v53 = vmul.f32 0.6931472, %v2301_v48  ;;  %v2303_v54 = vpop.eup %2302  ;;  %v1650_v63 = vadd.f32 1e-07, %v1648_v60 }
 0x32b   : > { %v1579_v51 = vperm.slane %v1575_v49, 1  ;;  %v2305_v59 = vpop.eup %2304  ;;  %v1949_v61 = vmul.f32 0.6931472, %v2303_v54  ;;  %v1567_v29 = vpop.xlane.xlu1 %1566 }
 0x32c   : > { %v1825_v6 = vrot.slane %v1822_v52, 7  ;;  %v1953_v58 = vsub.f32 0.0, %v1951_v53  ;;  %v2082_v17 = vmul.f32 0.6931472, %v2305_v59  ;;  %v1654_v13 = vrot.slane %v1650_v63, 2 }
 0x32d   : > { %v1581_v3 = vmul.f32 %v1579_v51, %v1575_v49  ;;  %v1952_v1 = vsub.f32 0.0, %v1949_v61  ;;  %v2307_v2 = vpop.eup %2306 }
 0x32e   : > { %v1826_v57 = vsel %vm1696_vm13, %v1825_v6, %v1821_v5  ;;  %v1956_v62 = vrot.slane %v1953_v58, 7  ;;  %v2084_v31 = vsub.f32 0.0, %v2082_v17  ;;  %v2080_v19 = vmul.f32 0.6931472, %v2307_v2 }
 0x32f   : > { %v1583_v56 = vmax.f32 %v1581_v3, 1e-12  ;;  %1827 = vrot.lane.b32.xlu0 %v1826_v57, %s2343_s29  ;;  %v1683_v45 = vand.u32 2147483648, %v1654_v13  ;;  %vm1677_vm2 = vweird.f32 %v1654_v13  ;;  %v1681_v14 = vand.u32 2147483647, %v1654_v13 }
 0x330   : > { %v1957_v8 = vsel %vm1696_vm13, %v1956_v62, %v1952_v1  ;;  %v2087_v15 = vrot.slane %v2084_v31, 7  ;;  %v2083_v25 = vsub.f32 0.0, %v2080_v19 }
 0x331   : > { %2308 = vrsqrt.f32 %v1583_v56  ;;  %vm1591_vm15 = vweird.f32 %v1583_v56  ;;  %v1684_v42 = vor.u32 1.1754944e-38, %v1683_v45  ;;  %vm1682_vm4 = vcmp.eq.f32.partialorder %v1681_v14, 8.507059e+37 }
 0x332   : > { %2310 = vrcp.f32 %v1654_v13  ;;  %v2088_v26 = vsel %vm1696_vm13, %v2087_v15, %v2083_v25 }
 0x337   : > { %v2309_v4 = vpop.eup %2308  ;;  %1958 = vrot.lane.b32.xlu0 %v1957_v8, %s2344_s30 }
 0x338   : > { %v1586_v9 = vmul.f32 %v2309_v4, %v1583_v56  ;;  %vm1592_vm14 = vweird.f32 %v2309_v4  ;;  %v2311_v11 = vpop.eup %2310 }
 0x339   : > { %vm1593_vm0 = vmor %vm1591_vm15, %vm1592_vm14  ;;  %v1673_v18 = vmul.f32 %v2311_v11, %v1654_v13  ;;  %vm1678_vm1 = vweird.f32 %v2311_v11 }
 0x33a   : > { %v1587_v22 = vmul.f32 %v2309_v4, %v1586_v9  ;;  %vm1679_vm3 = vmor %vm1677_vm2, %vm1678_vm1 }
 0x33b   : > { %v1674_v35 = vsub.f32 1.0, %v1673_v18 }
 0x33c   : > { %v1588_v21 = vmul.f32 0.5, %v1587_v22 }
 0x33d   : > { %v1675_v39 = vmul.f32 %v2311_v11, %v1674_v35 }
 0x33e   : > { %v1589_v16 = vsub.f32 1.5, %v1588_v21 }
 0x33f   : > { %2089 = vrot.lane.b32.xlu0 %v2088_v26, %s2345_s10  ;;  %v1676_v43 = vadd.f32 %v2311_v11, %v1675_v39 }
 0x340   : > { %v1590_v27 = vmul.f32 %v2309_v4, %v1589_v16 }
 0x342   : > { %v1594_v28 = vsel %vm1593_vm0, %v2309_v4, %v1590_v27 }
 0x343   : > { %v1605_v23 = vmul.f32 %v1594_v28, %v1567_v29 }
 0x345   : > { %v1607_v33 = vmul.f32 2.0, %v1605_v23 }
 0x347   : > { %v1627_v34 = vmul.f32 %v2997_v7, %v1607_v33  ;;  %v1618_v10 = vmul.f32 %v3025_v32, %v1607_v33  ;;  %v1680_v7 = vsel %vm1679_vm3, %v2311_v11, %v1676_v43 }
 0x348   : > { %v1685_v32 = vsel %vm1682_vm4, %v1684_v42, %v1680_v7 }
 0x349   : > { %v1631_v30 = vrot.slane %v1627_v34, 1  ;;  %v1637_v37 = vrot.slane %v1627_v34, 2  ;;  %v1643_v12 = vrot.slane %v1627_v34, 3  ;;  %v1686_v48 = vmul.f32 %v1685_v32, %v3056_v24 }
 0x34b   : > { %v1635_v36 = vadd.f32 %v1631_v30, %v1618_v10 }
 0x34d   : > { %v1641_v38 = vadd.f32 %v1637_v37, %v1635_v36 }
 0x34f   : > { %v1647_v40 = vadd.f32 %v1643_v12, %v1641_v38 }
 0x351   : > { %v1649_v41 = vadd.f32 1e-07, %v1647_v40 }
 0x353   : > { %v1653_v44 = vrot.slane %v1649_v41, 2 }
 0x355   : > { %2312 = vrcp.f32 %v1653_v44  ;;  %v1668_v50 = vand.u32 2147483648, %v1653_v44  ;;  %v1666_v52 = vand.u32 2147483647, %v1653_v44  ;;  %vm1662_vm6 = vweird.f32 %v1653_v44 }
 0x356   : > { %2314 = vlog2.f32 %v1686_v48 }
 0x357   : > { %v1669_v20 = vor.u32 1.1754944e-38, %v1668_v50  ;;  %vm1667_vm8 = vcmp.eq.f32.partialorder %v1666_v52, 8.507059e+37 }
 0x35b   : > { %v2313_v46 = vpop.eup %2312 }
 0x35c   : > { %v1658_v47 = vmul.f32 %v2313_v46, %v1653_v44  ;;  %vm1663_vm5 = vweird.f32 %v2313_v46  ;;  %v2315_v5 = vpop.eup %2314 }
 0x35d   : > { %vm1664_vm7 = vmor %vm1662_vm6, %vm1663_vm5  ;;  %v1690_v54 = vmul.f32 0.6931472, %v2315_v5 }
 0x35e   : > { %v1659_v49 = vsub.f32 1.0, %v1658_v47 }
 0x35f   : > { %v1692_v55 = vsub.f32 0.0, %v1690_v54 }
 0x360   : > { %v1660_v51 = vmul.f32 %v2313_v46, %v1659_v49 }
 0x361   : > { %v1695_v58 = vrot.slane %v1692_v55, 7 }
 0x362   : > { %v1661_v53 = vadd.f32 %v2313_v46, %v1660_v51 }
 0x364   : > { %v1665_v0 = vsel %vm1664_vm7, %v2313_v46, %v1661_v53 }
 0x365   : > { %v1670_v3 = vsel %vm1667_vm8, %v1669_v20, %v1665_v0 }
 0x366   : > { %v1671_v6 = vmul.f32 %v1670_v3, %v1607_v33 }
 0x368   : > { %2316 = vlog2.f32 %v1671_v6 }
 0x36e   : > { %v2317_v56 = vpop.eup %2316 }
 0x36f   : > { %v1688_v24 = vmul.f32 0.6931472, %v2317_v56 }
 0x371   : > { %v1691_v57 = vsub.f32 0.0, %v1688_v24 }
 0x373   : > { %v1697_v59 = vsel %vm1696_vm13, %v1695_v58, %v1691_v57 }
 0x374   : > { %1700 = vst.msk [vmem:[%s3184_s7] sm:$0x3] %vm1699_vm9, %v1697_v59 }
 0x3a1   : > { %v1828_v60 = vpop.permute.xlu0 %1827 }
 0x3a2   : > { %1831 = vst.msk [vmem:[%s3184_s7] sm:$0x3] %vm1830_vm10, %v1828_v60 }
 0x3a9   : > { %v1959_v61 = vpop.permute.xlu0 %1958 }
 0x3aa   : > { %1962 = vst.msk [vmem:[%s3184_s7] sm:$0x3] %vm1961_vm11, %v1959_v61 }
 0x3b1   : > { %v2090_v62 = vpop.permute.xlu0 %2089 }
 0x3b2   : > { %2093 = vst.msk [vmem:[%s3184_s7] sm:$0x3] %vm2092_vm12, %v2090_v62 }
 0x3b3 PF: > { %p14_p10 = scmp.ge.s32.totalorder %s2403_s28, 4   ;;  %s3198_s24 = smov %s2336_s25 }
 0x3b4   : > { %s3199_s25 = smov %s2412_s8  ;;  %s3200_s26 = smov %s2403_s28 }
 0x3b5   :  { %16 = sbr.rel (!%p14_p10) target bundleno = 2 (0x2), region = 234 }

</bundles_post_ra>
